<compile_context>
chip_gen: v7x
topology: tpu7x:2x2x1
jax: 0.10.0
libtpu: 0.0.40
codegen_flags: <defaults>
</compile_context>

<pallas_src>
import functools

import numpy as np
import jax
import jax.numpy as jnp
from jax.experimental import pallas as pl
from jax.experimental.pallas import tpu as pltpu

COORDS_WEIGHT = 1.0
J = 4  # coord "rows" per node (edge_coords_nf = 4*4 = 16)


def _egcl_kernel(row_oh_ref, col_oh_ref, scat_oh_ref, inv_cnt_ref,
                 h_ref, cf_ref, ea_ref, pa_ref, pb_ref, r_ref,
                 w1hr_ref, w1hc_ref, w1rd_ref, w1ea_ref, be1_ref,
                 we2_ref, be2_ref, wc1_ref, bc1_ref, wc2e_ref,
                 wn1x_ref, wn1a_ref, bn1_ref, wn2_ref, bn2_ref,
                 hout_ref, cout_ref):
    F = h_ref.shape[1]
    CD = cf_ref.shape[1]
    bf16 = jnp.bfloat16
    dot = functools.partial(jnp.dot, preferred_element_type=jnp.float32)

    h = h_ref[...]                                   # (BN, F)  f32
    cf = cf_ref[...]                                 # (BN, CD) f32
    h_bf = h.astype(bf16)
    cf_bf = cf.astype(bf16)

    # ---- gather: one merged RHS [h | coord] per one-hot (2 matmuls total) ----
    hc = jnp.concatenate([h_bf, cf_bf], axis=1)      # (BN, F+CD) bf16
    g_row = dot(row_oh_ref[...], hc)                 # (BE, F+CD) f32
    g_col = dot(col_oh_ref[...], hc)
    h_row = g_row[:, :F]
    h_col = g_col[:, :F]
    cd = g_row[:, F:] - g_col[:, F:]                 # coord_diff, flat (BE, CD) f32
    cd_bf = cd.astype(bf16)

    # ---- radial = F.normalize(Gram(coord_diff)) via constant expansion matmuls
    a_exp = dot(cd_bf, pa_ref[...])                  # (BE, J*CD)
    b_exp = dot(cd_bf, pb_ref[...])
    cdp = dot((a_exp * b_exp).astype(bf16), r_ref[...])   # (BE, J*J)
    sumsq = jnp.sum(cdp * cdp, axis=1, keepdims=True)
    radial = cdp * jax.lax.rsqrt(jnp.maximum(sumsq, 1e-24))   # == x / max(||x||, 1e-12)

    # ---- edge_mlp: Linear -> ReLU -> Linear -> ReLU (layer 1 as partial dots) -
    e1 = jnp.maximum(
        dot(h_row.astype(bf16), w1hr_ref[...])
        + dot(h_col.astype(bf16), w1hc_ref[...])
        + dot(radial.astype(bf16), w1rd_ref[...])
        + dot(ea_ref[...], w1ea_ref[...])
        + be1_ref[...], 0.0)
    edge_feat = jnp.maximum(dot(e1.astype(bf16), we2_ref[...]) + be2_ref[...], 0.0)

    # ---- coord_mlp: Linear -> ReLU -> Linear(no bias); wc2 pre-expanded to CD -
    c1 = jnp.maximum(dot(edge_feat.astype(bf16), wc1_ref[...]) + bc1_ref[...], 0.0)
    mult = dot(c1.astype(bf16), wc2e_ref[...])       # (BE, CD) == cvec repeated per t
    trans = cd * mult                                # coord_diff * cvec[..., None], flat

    # ---- merged scatter: one (BN, BE) @ (BE, CD+H) matmul ---------------------
    scat_rhs = jnp.concatenate([trans.astype(bf16), edge_feat.astype(bf16)], axis=1)
    agg = dot(scat_oh_ref[...], scat_rhs)            # (BN, CD+H) f32
    agg_c = agg[:, :CD]
    agg_h = agg[:, CD:]

    # segment-mean via precomputed inverse counts; residual in f32
    cout_ref[...] = cf + COORDS_WEIGHT * agg_c * inv_cnt_ref[...]

    # ---- node_mlp: Linear -> ReLU -> Linear, recurrent residual ---------------
    n1 = jnp.maximum(
        dot(h_bf, wn1x_ref[...]) + dot(agg_h.astype(bf16), wn1a_ref[...])
        + bn1_ref[...], 0.0)
    hout_ref[...] = h + dot(n1.astype(bf16), wn2_ref[...]) + bn2_ref[...]


def egcl_x_forward(h, coord, row, col, edge_attr, params):
    """h: [B,N,F], coord: [B,N,4,T], row/col: [E] int32, edge_attr: [E,ED]."""
    B, N, F = h.shape
    Jc, T = coord.shape[2], coord.shape[3]
    assert Jc == J
    CD = J * T
    E = row.shape[0]
    H = params["we2"].shape[0]
    OF = params["wn2"].shape[1]
    # recurrent residual (h + node_mlp(...)) requires matching widths
    assert OF == F, "recurrent residual requires output_nf == input_nf"

    BN, BE = B * N, B * E
    bf16 = jnp.bfloat16

    # ---- batched (block-diagonal) graph structure, precomputed host-side -----
    # NOTE: row/col ids are assumed to be in [0, N); out-of-range ids would
    # silently gather zeros (one-hot compare is all-false) rather than error.
    offs = (jnp.arange(B, dtype=jnp.int32) * N)[:, None]
    row_b = (row.astype(jnp.int32)[None, :] + offs).reshape(-1)          # (BE,)
    col_b = (col.astype(jnp.int32)[None, :] + offs).reshape(-1)
    node_ids = jnp.arange(BN, dtype=jnp.int32)
    row_oh = (row_b[:, None] == node_ids[None, :]).astype(bf16)          # (BE, BN)
    col_oh = (col_b[:, None] == node_ids[None, :]).astype(bf16)          # (BE, BN)
    scat_oh = (node_ids[:, None] == row_b[None, :]).astype(bf16)         # (BN, BE)
    counts = jnp.sum((node_ids[:, None] == row_b[None, :]).astype(jnp.float32),
                     axis=1, keepdims=True)
    inv_cnt = 1.0 / jnp.maximum(counts, 1.0)                             # (BN, 1)

    # ---- constant expansion/reduction matrices for the 4x4 Gram + coord mult -
    pa = np.zeros((CD, J * CD), np.float32)
    pb = np.zeros((CD, J * CD), np.float32)
    rmat = np.zeros((J * CD, J * J), np.float32)
    expand = np.zeros((J, CD), np.float32)
    for j in range(J):
        expand[j, T * j:T * j + T] = 1.0
        for k in range(J):
            for t in range(T):
                m = CD * j + T * k + t
                pa[T * j + t, m] = 1.0       # cd[:, T*j+t]
                pb[T * k + t, m] = 1.0       # cd[:, T*k+t]
                rmat[m, J * j + k] = 1.0     # sum over t -> cdp[:, 4j+k]
    pa = jnp.asarray(pa, bf16)
    pb = jnp.asarray(pb, bf16)
    rmat = jnp.asarray(rmat, bf16)

    # ---- weights: bf16 MXU operands, row-split to avoid in-kernel concats ----
    we1 = params["we1"]
    w1hr = we1[:F].astype(bf16)                       # source (h[row]) rows
    w1hc = we1[F:2 * F].astype(bf16)                  # target (h[col]) rows
    w1rd = we1[2 * F:2 * F + J * J].astype(bf16)      # radial rows
    w1ea = we1[2 * F + J * J:].astype(bf16)           # edge_attr rows
    wn1 = params["wn1"]
    wn1x = wn1[:F].astype(bf16)                       # h rows
    wn1a = wn1[F:].astype(bf16)                       # agg rows
    wc2e = (params["wc2"] @ jnp.asarray(expand)).astype(bf16)   # (H, CD)
    we2 = params["we2"].astype(bf16)
    wc1 = params["wc1"].astype(bf16)
    wn2 = params["wn2"].astype(bf16)
    be1, be2, bc1 = params["be1"], params["be2"], params["bc1"]
    bn1, bn2 = params["bn1"], params["bn2"]

    # ---- data layout: batch folded into the node / edge dimension ------------
    h2 = h.reshape(BN, F)
    cf2 = coord.reshape(BN, CD)                       # j-major, t-minor
    ea_b = jnp.tile(edge_attr, (B, 1)).astype(bf16)   # (BE, ED), graph shared per batch

    inputs = [row_oh, col_oh, scat_oh, inv_cnt, h2, cf2, ea_b, pa, pb, rmat,
              w1hr, w1hc, w1rd, w1ea, be1, we2, be2, wc1, bc1, wc2e,
              wn1x, wn1a, bn1, wn2, bn2]

    def full_spec(x):
        return pl.BlockSpec(x.shape, lambda i, nd=x.ndim: (0,) * nd)

    hout, cout = pl.pallas_call(
        _egcl_kernel,
        grid=(1,),
        in_specs=[full_spec(x) for x in inputs],
        out_specs=[
            pl.BlockSpec((BN, OF), lambda i: (0, 0)),
            pl.BlockSpec((BN, CD), lambda i: (0, 0)),
        ],
        out_shape=[
            jax.ShapeDtypeStruct((BN, OF), jnp.float32),
            jax.ShapeDtypeStruct((BN, CD), jnp.float32),
        ],
        compiler_params=pltpu.CompilerParams(
            dimension_semantics=("arbitrary",)),
    )(*inputs)

    return hout.reshape(B, N, OF), cout.reshape(B, N, J, T)


# ----------------------- pure-JAX reference (for checking) -----------------------
def _ref_forward(h, coord, row, col, edge_attr, p):
    relu = lambda x: jnp.maximum(x, 0.0)

    def one(hb, cb):
        N = hb.shape[0]
        cd = cb[row] - cb[col]                                 # (E,4,T)
        E = cd.shape[0]
        cdp = jnp.einsum('ejt,ekt->ejk', cd, cd).reshape(E, -1)
        radial = cdp / jnp.maximum(
            jnp.linalg.norm(cdp, axis=-1, keepdims=True), 1e-12)
        edge_in = jnp.concatenate([hb[row], hb[col], radial, edge_attr], axis=1)
        ef = relu(relu(edge_in @ p["we1"] + p["be1"]) @ p["we2"] + p["be2"])
        cvec = relu(ef @ p["wc1"] + p["bc1"]) @ p["wc2"]
        trans = cd * cvec[:, :, None]
        agg = jax.ops.segment_sum(trans, row, num_segments=N)
        cnt = jax.ops.segment_sum(jnp.ones_like(trans), row, num_segments=N)
        coord_new = cb + COORDS_WEIGHT * agg / jnp.maximum(cnt, 1.0)
        aggh = jax.ops.segment_sum(ef, row, num_segments=N)
        node_in = jnp.concatenate([hb, aggh], axis=1)
        h_new = hb + (relu(node_in @ p["wn1"] + p["bn1"]) @ p["wn2"] + p["bn2"])
        return h_new, coord_new

    return jax.vmap(one)(h, coord)


if __name__ == "__main__":
    B, N, T = 2, 8, 3
    input_nf = output_nf = hidden_nf = 32
    edges_in_d = 4
    edge_coords_nf = J * J  # 16

    # fully-connected directed graph (no self loops), shared across batch
    pairs = [(i, j) for i in range(N) for j in range(N) if i != j]
    row = jnp.array([p[0] for p in pairs], dtype=jnp.int32)   # (E,)
    col = jnp.array([p[1] for p in pairs], dtype=jnp.int32)
    E = row.shape[0]

    key = jax.random.PRNGKey(0)
    keys = jax.random.split(key, 16)

    def lin(k, fan_in, fan_out, scale=None):
        s = scale if scale is not None else 1.0 / jnp.sqrt(float(fan_in))
        return jax.random.normal(k, (fan_in, fan_out), jnp.float32) * s

    d_edge_in = 2 * input_nf + edge_coords_nf + edges_in_d
    params = {
        "we1": lin(keys[0], d_edge_in, hidden_nf),
        "be1": jax.random.normal(keys[1], (1, hidden_nf), jnp.float32) * 0.01,
        "we2": lin(keys[2], hidden_nf, hidden_nf),
        "be2": jax.random.normal(keys[3], (1, hidden_nf), jnp.float32) * 0.01,
        "wc1": lin(keys[4], hidden_nf, hidden_nf),
        "bc1": jax.random.normal(keys[5], (1, hidden_nf), jnp.float32) * 0.01,
        "wc2": lin(keys[6], hidden_nf, J, scale=0.001),        # xavier gain=0.001, no bias
        "wn1": lin(keys[7], hidden_nf + input_nf, hidden_nf),
        "bn1": jax.random.normal(keys[8], (1, hidden_nf), jnp.float32) * 0.01,
        "wn2": lin(keys[9], hidden_nf, output_nf),
        "bn2": jax.random.normal(keys[10], (1, output_nf), jnp.float32) * 0.01,
    }
    # TODO(synk): adj_mlp / coord_mlp_pos / att_mlp exist in __init__ but are unused
    # in forward() (attention=False, tanh=False), so they are not materialized here.

    h = jax.random.normal(keys[11], (B, N, input_nf), jnp.float32)
    coord = jax.random.normal(keys[12], (B, N, J, T), jnp.float32)
    edge_attr = jax.random.normal(keys[13], (E, edges_in_d), jnp.float32)

    hs, coords = egcl_x_forward(h, coord, row, col, edge_attr, params)
    hs, coords = jax.block_until_ready((hs, coords))

    hs_ref, coords_ref = _ref_forward(h, coord, row, col, edge_attr, params)
    err_h = float(jnp.max(jnp.abs(hs - hs_ref)))
    err_c = float(jnp.max(jnp.abs(coords - coords_ref)))
    assert hs.shape == (B, N, output_nf) and coords.shape == (B, N, J, T)
    # bf16 MXU operands with f32 accumulation -> tolerance relaxed vs pure-f32 ref
    assert err_h < 5e-2 and err_c < 5e-2, (err_h, err_c)

    print("KERNEL_OK")
</pallas_src>

<mosaic_0001>
module attributes {stable_mosaic.version = 11 : i64} {
  func.func @_egcl_kernel(%arg0: i32, %arg1: memref<112x16xbf16, #tpu.memory_space<vmem>>, %arg2: memref<112x16xbf16, #tpu.memory_space<vmem>>, %arg3: memref<16x112xbf16, #tpu.memory_space<vmem>>, %arg4: memref<16x1xf32, #tpu.memory_space<vmem>>, %arg5: memref<16x32xf32, #tpu.memory_space<vmem>>, %arg6: memref<16x12xf32, #tpu.memory_space<vmem>>, %arg7: memref<112x4xbf16, #tpu.memory_space<vmem>>, %arg8: memref<12x48xbf16, #tpu.memory_space<vmem>>, %arg9: memref<12x48xbf16, #tpu.memory_space<vmem>>, %arg10: memref<48x16xbf16, #tpu.memory_space<vmem>>, %arg11: memref<32x32xbf16, #tpu.memory_space<vmem>>, %arg12: memref<32x32xbf16, #tpu.memory_space<vmem>>, %arg13: memref<16x32xbf16, #tpu.memory_space<vmem>>, %arg14: memref<4x32xbf16, #tpu.memory_space<vmem>>, %arg15: memref<1x32xf32, #tpu.memory_space<vmem>>, %arg16: memref<32x32xbf16, #tpu.memory_space<vmem>>, %arg17: memref<1x32xf32, #tpu.memory_space<vmem>>, %arg18: memref<32x32xbf16, #tpu.memory_space<vmem>>, %arg19: memref<1x32xf32, #tpu.memory_space<vmem>>, %arg20: memref<32x12xbf16, #tpu.memory_space<vmem>>, %arg21: memref<32x32xbf16, #tpu.memory_space<vmem>>, %arg22: memref<32x32xbf16, #tpu.memory_space<vmem>>, %arg23: memref<1x32xf32, #tpu.memory_space<vmem>>, %arg24: memref<32x32xbf16, #tpu.memory_space<vmem>>, %arg25: memref<1x32xf32, #tpu.memory_space<vmem>>, %arg26: memref<16x32xf32, #tpu.memory_space<vmem>>, %arg27: memref<16x12xf32, #tpu.memory_space<vmem>>) attributes {dimension_semantics = [#tpu.dimension_semantics<arbitrary>], iteration_bounds = array<i64: 1>, scalar_prefetch = 0 : i64, scratch_operands = 0 : i64, tpu.core_type = #tpu.core_type<tc>, window_params = [{pipeline_mode = #tpu.pipeline_mode<synchronous>, transform_indices = @transform_0, window_bounds = array<i64: 112, 16>}, {pipeline_mode = #tpu.pipeline_mode<synchronous>, transform_indices = @transform_1, window_bounds = array<i64: 112, 16>}, {pipeline_mode = #tpu.pipeline_mode<synchronous>, transform_indices = @transform_2, window_bounds = array<i64: 16, 112>}, {pipeline_mode = #tpu.pipeline_mode<synchronous>, transform_indices = @transform_3, window_bounds = array<i64: 16, 1>}, {pipeline_mode = #tpu.pipeline_mode<synchronous>, transform_indices = @transform_4, window_bounds = array<i64: 16, 32>}, {pipeline_mode = #tpu.pipeline_mode<synchronous>, transform_indices = @transform_5, window_bounds = array<i64: 16, 12>}, {pipeline_mode = #tpu.pipeline_mode<synchronous>, transform_indices = @transform_6, window_bounds = array<i64: 112, 4>}, {pipeline_mode = #tpu.pipeline_mode<synchronous>, transform_indices = @transform_7, window_bounds = array<i64: 12, 48>}, {pipeline_mode = #tpu.pipeline_mode<synchronous>, transform_indices = @transform_8, window_bounds = array<i64: 12, 48>}, {pipeline_mode = #tpu.pipeline_mode<synchronous>, transform_indices = @transform_9, window_bounds = array<i64: 48, 16>}, {pipeline_mode = #tpu.pipeline_mode<synchronous>, transform_indices = @transform_10, window_bounds = array<i64: 32, 32>}, {pipeline_mode = #tpu.pipeline_mode<synchronous>, transform_indices = @transform_11, window_bounds = array<i64: 32, 32>}, {pipeline_mode = #tpu.pipeline_mode<synchronous>, transform_indices = @transform_12, window_bounds = array<i64: 16, 32>}, {pipeline_mode = #tpu.pipeline_mode<synchronous>, transform_indices = @transform_13, window_bounds = array<i64: 4, 32>}, {pipeline_mode = #tpu.pipeline_mode<synchronous>, transform_indices = @transform_14, window_bounds = array<i64: 1, 32>}, {pipeline_mode = #tpu.pipeline_mode<synchronous>, transform_indices = @transform_15, window_bounds = array<i64: 32, 32>}, {pipeline_mode = #tpu.pipeline_mode<synchronous>, transform_indices = @transform_16, window_bounds = array<i64: 1, 32>}, {pipeline_mode = #tpu.pipeline_mode<synchronous>, transform_indices = @transform_17, window_bounds = array<i64: 32, 32>}, {pipeline_mode = #tpu.pipeline_mode<synchronous>, transform_indices = @transform_18, window_bounds = array<i64: 1, 32>}, {pipeline_mode = #tpu.pipeline_mode<synchronous>, transform_indices = @transform_19, window_bounds = array<i64: 32, 12>}, {pipeline_mode = #tpu.pipeline_mode<synchronous>, transform_indices = @transform_20, window_bounds = array<i64: 32, 32>}, {pipeline_mode = #tpu.pipeline_mode<synchronous>, transform_indices = @transform_21, window_bounds = array<i64: 32, 32>}, {pipeline_mode = #tpu.pipeline_mode<synchronous>, transform_indices = @transform_22, window_bounds = array<i64: 1, 32>}, {pipeline_mode = #tpu.pipeline_mode<synchronous>, transform_indices = @transform_23, window_bounds = array<i64: 32, 32>}, {pipeline_mode = #tpu.pipeline_mode<synchronous>, transform_indices = @transform_24, window_bounds = array<i64: 1, 32>}, {pipeline_mode = #tpu.pipeline_mode<synchronous>, transform_indices = @transform_25, window_bounds = array<i64: 16, 32>}, {pipeline_mode = #tpu.pipeline_mode<synchronous>, transform_indices = @transform_26, window_bounds = array<i64: 16, 12>}]} {
    %c0 = arith.constant 0 : index
    %c0_0 = arith.constant 0 : index
    %0 = vector.load %arg5[%c0, %c0_0] : memref<16x32xf32, #tpu.memory_space<vmem>>, vector<16x32xf32>
    %c0_1 = arith.constant 0 : index
    %c0_2 = arith.constant 0 : index
    %1 = vector.load %arg6[%c0_1, %c0_2] : memref<16x12xf32, #tpu.memory_space<vmem>>, vector<16x12xf32>
    %2 = arith.truncf %0 : vector<16x32xf32> to vector<16x32xbf16>
    %3 = arith.truncf %1 : vector<16x12xf32> to vector<16x12xbf16>
    %4 = tpu.concatenate %2, %3 in 1 : vector<16x32xbf16>, vector<16x12xbf16> -> vector<16x44xbf16>
    %c0_3 = arith.constant 0 : index
    %c0_4 = arith.constant 0 : index
    %5 = vector.load %arg1[%c0_3, %c0_4] : memref<112x16xbf16, #tpu.memory_space<vmem>>, vector<112x16xbf16>
    %cst = arith.constant dense<0.000000e+00> : vector<112x44xf32>
    %6 = tpu.matmul %5, %4, %cst {dimension_numbers = #tpu.dot_dimension_numbers<[1], [0], [0], [1], [0, 0, 1, 1], [], []>} : vector<112x16xbf16>, vector<16x44xbf16>, vector<112x44xf32> -> vector<112x44xf32>
    %c0_5 = arith.constant 0 : index
    %c0_6 = arith.constant 0 : index
    %7 = vector.load %arg2[%c0_5, %c0_6] : memref<112x16xbf16, #tpu.memory_space<vmem>>, vector<112x16xbf16>
    %cst_7 = arith.constant dense<0.000000e+00> : vector<112x44xf32>
    %8 = tpu.matmul %7, %4, %cst_7 {dimension_numbers = #tpu.dot_dimension_numbers<[1], [0], [0], [1], [0, 0, 1, 1], [], []>} : vector<112x16xbf16>, vector<16x44xbf16>, vector<112x44xf32> -> vector<112x44xf32>
    %9 = vector.extract_strided_slice %6 {offsets = [0, 0], sizes = [112, 32], strides = [1, 1]} : vector<112x44xf32> to vector<112x32xf32>
    %10 = vector.extract_strided_slice %8 {offsets = [0, 0], sizes = [112, 32], strides = [1, 1]} : vector<112x44xf32> to vector<112x32xf32>
    %11 = vector.extract_strided_slice %6 {offsets = [0, 32], sizes = [112, 12], strides = [1, 1]} : vector<112x44xf32> to vector<112x12xf32>
    %12 = vector.extract_strided_slice %8 {offsets = [0, 32], sizes = [112, 12], strides = [1, 1]} : vector<112x44xf32> to vector<112x12xf32>
    %13 = arith.subf %11, %12 : vector<112x12xf32>
    %14 = arith.truncf %13 : vector<112x12xf32> to vector<112x12xbf16>
    %c0_8 = arith.constant 0 : index
    %c0_9 = arith.constant 0 : index
    %15 = vector.load %arg8[%c0_8, %c0_9] : memref<12x48xbf16, #tpu.memory_space<vmem>>, vector<12x48xbf16>
    %cst_10 = arith.constant dense<0.000000e+00> : vector<112x48xf32>
    %16 = tpu.matmul %14, %15, %cst_10 {dimension_numbers = #tpu.dot_dimension_numbers<[1], [0], [0], [1], [0, 0, 1, 1], [], []>} : vector<112x12xbf16>, vector<12x48xbf16>, vector<112x48xf32> -> vector<112x48xf32>
    %c0_11 = arith.constant 0 : index
    %c0_12 = arith.constant 0 : index
    %17 = vector.load %arg9[%c0_11, %c0_12] : memref<12x48xbf16, #tpu.memory_space<vmem>>, vector<12x48xbf16>
    %cst_13 = arith.constant dense<0.000000e+00> : vector<112x48xf32>
    %18 = tpu.matmul %14, %17, %cst_13 {dimension_numbers = #tpu.dot_dimension_numbers<[1], [0], [0], [1], [0, 0, 1, 1], [], []>} : vector<112x12xbf16>, vector<12x48xbf16>, vector<112x48xf32> -> vector<112x48xf32>
    %19 = arith.mulf %16, %18 : vector<112x48xf32>
    %20 = arith.truncf %19 : vector<112x48xf32> to vector<112x48xbf16>
    %c0_14 = arith.constant 0 : index
    %c0_15 = arith.constant 0 : index
    %21 = vector.load %arg10[%c0_14, %c0_15] : memref<48x16xbf16, #tpu.memory_space<vmem>>, vector<48x16xbf16>
    %cst_16 = arith.constant dense<0.000000e+00> : vector<112x16xf32>
    %22 = tpu.matmul %20, %21, %cst_16 {dimension_numbers = #tpu.dot_dimension_numbers<[1], [0], [0], [1], [0, 0, 1, 1], [], []>} : vector<112x48xbf16>, vector<48x16xbf16>, vector<112x16xf32> -> vector<112x16xf32>
    %23 = arith.mulf %22, %22 : vector<112x16xf32>
    %cst_17 = arith.constant dense<0.000000e+00> : vector<112xf32>
    %24 = vector.multi_reduction <add>, %23, %cst_17 [1] : vector<112x16xf32> to vector<112xf32>
    %25 = vector.shape_cast %24 : vector<112xf32> to vector<112x1xf32>
    %cst_18 = arith.constant 1.000000e-24 : f32
    %26 = vector.broadcast %cst_18 : f32 to vector<112x1xf32>
    %27 = arith.maximumf %25, %26 : vector<112x1xf32>
    %28 = math.rsqrt %27 : vector<112x1xf32>
    %29 = vector.broadcast %28 : vector<112x1xf32> to vector<112x16xf32>
    %30 = arith.mulf %22, %29 : vector<112x16xf32>
    %31 = arith.truncf %9 : vector<112x32xf32> to vector<112x32xbf16>
    %c0_19 = arith.constant 0 : index
    %c0_20 = arith.constant 0 : index
    %32 = vector.load %arg11[%c0_19, %c0_20] : memref<32x32xbf16, #tpu.memory_space<vmem>>, vector<32x32xbf16>
    %cst_21 = arith.constant dense<0.000000e+00> : vector<112x32xf32>
    %33 = tpu.matmul %31, %32, %cst_21 {dimension_numbers = #tpu.dot_dimension_numbers<[1], [0], [0], [1], [0, 0, 1, 1], [], []>} : vector<112x32xbf16>, vector<32x32xbf16>, vector<112x32xf32> -> vector<112x32xf32>
    %34 = arith.truncf %10 : vector<112x32xf32> to vector<112x32xbf16>
    %c0_22 = arith.constant 0 : index
    %c0_23 = arith.constant 0 : index
    %35 = vector.load %arg12[%c0_22, %c0_23] : memref<32x32xbf16, #tpu.memory_space<vmem>>, vector<32x32xbf16>
    %cst_24 = arith.constant dense<0.000000e+00> : vector<112x32xf32>
    %36 = tpu.matmul %34, %35, %cst_24 {dimension_numbers = #tpu.dot_dimension_numbers<[1], [0], [0], [1], [0, 0, 1, 1], [], []>} : vector<112x32xbf16>, vector<32x32xbf16>, vector<112x32xf32> -> vector<112x32xf32>
    %37 = arith.addf %33, %36 : vector<112x32xf32>
    %38 = arith.truncf %30 : vector<112x16xf32> to vector<112x16xbf16>
    %c0_25 = arith.constant 0 : index
    %c0_26 = arith.constant 0 : index
    %39 = vector.load %arg13[%c0_25, %c0_26] : memref<16x32xbf16, #tpu.memory_space<vmem>>, vector<16x32xbf16>
    %cst_27 = arith.constant dense<0.000000e+00> : vector<112x32xf32>
    %40 = tpu.matmul %38, %39, %cst_27 {dimension_numbers = #tpu.dot_dimension_numbers<[1], [0], [0], [1], [0, 0, 1, 1], [], []>} : vector<112x16xbf16>, vector<16x32xbf16>, vector<112x32xf32> -> vector<112x32xf32>
    %41 = arith.addf %37, %40 : vector<112x32xf32>
    %c0_28 = arith.constant 0 : index
    %c0_29 = arith.constant 0 : index
    %42 = vector.load %arg7[%c0_28, %c0_29] : memref<112x4xbf16, #tpu.memory_space<vmem>>, vector<112x4xbf16>
    %c0_30 = arith.constant 0 : index
    %c0_31 = arith.constant 0 : index
    %43 = vector.load %arg14[%c0_30, %c0_31] : memref<4x32xbf16, #tpu.memory_space<vmem>>, vector<4x32xbf16>
    %cst_32 = arith.constant dense<0.000000e+00> : vector<112x32xf32>
    %44 = tpu.matmul %42, %43, %cst_32 {dimension_numbers = #tpu.dot_dimension_numbers<[1], [0], [0], [1], [0, 0, 1, 1], [], []>} : vector<112x4xbf16>, vector<4x32xbf16>, vector<112x32xf32> -> vector<112x32xf32>
    %45 = arith.addf %41, %44 : vector<112x32xf32>
    %c0_33 = arith.constant 0 : index
    %c0_34 = arith.constant 0 : index
    %46 = vector.load %arg15[%c0_33, %c0_34] : memref<1x32xf32, #tpu.memory_space<vmem>>, vector<1x32xf32>
    %47 = vector.broadcast %46 : vector<1x32xf32> to vector<112x32xf32>
    %48 = arith.addf %45, %47 : vector<112x32xf32>
    %cst_35 = arith.constant 0.000000e+00 : f32
    %49 = vector.broadcast %cst_35 : f32 to vector<112x32xf32>
    %50 = arith.maximumf %48, %49 : vector<112x32xf32>
    %51 = arith.truncf %50 : vector<112x32xf32> to vector<112x32xbf16>
    %c0_36 = arith.constant 0 : index
    %c0_37 = arith.constant 0 : index
    %52 = vector.load %arg16[%c0_36, %c0_37] : memref<32x32xbf16, #tpu.memory_space<vmem>>, vector<32x32xbf16>
    %cst_38 = arith.constant dense<0.000000e+00> : vector<112x32xf32>
    %53 = tpu.matmul %51, %52, %cst_38 {dimension_numbers = #tpu.dot_dimension_numbers<[1], [0], [0], [1], [0, 0, 1, 1], [], []>} : vector<112x32xbf16>, vector<32x32xbf16>, vector<112x32xf32> -> vector<112x32xf32>
    %c0_39 = arith.constant 0 : index
    %c0_40 = arith.constant 0 : index
    %54 = vector.load %arg17[%c0_39, %c0_40] : memref<1x32xf32, #tpu.memory_space<vmem>>, vector<1x32xf32>
    %55 = vector.broadcast %54 : vector<1x32xf32> to vector<112x32xf32>
    %56 = arith.addf %53, %55 : vector<112x32xf32>
    %cst_41 = arith.constant 0.000000e+00 : f32
    %57 = vector.broadcast %cst_41 : f32 to vector<112x32xf32>
    %58 = arith.maximumf %56, %57 : vector<112x32xf32>
    %59 = arith.truncf %58 : vector<112x32xf32> to vector<112x32xbf16>
    %c0_42 = arith.constant 0 : index
    %c0_43 = arith.constant 0 : index
    %60 = vector.load %arg18[%c0_42, %c0_43] : memref<32x32xbf16, #tpu.memory_space<vmem>>, vector<32x32xbf16>
    %cst_44 = arith.constant dense<0.000000e+00> : vector<112x32xf32>
    %61 = tpu.matmul %59, %60, %cst_44 {dimension_numbers = #tpu.dot_dimension_numbers<[1], [0], [0], [1], [0, 0, 1, 1], [], []>} : vector<112x32xbf16>, vector<32x32xbf16>, vector<112x32xf32> -> vector<112x32xf32>
    %c0_45 = arith.constant 0 : index
    %c0_46 = arith.constant 0 : index
    %62 = vector.load %arg19[%c0_45, %c0_46] : memref<1x32xf32, #tpu.memory_space<vmem>>, vector<1x32xf32>
    %63 = vector.broadcast %62 : vector<1x32xf32> to vector<112x32xf32>
    %64 = arith.addf %61, %63 : vector<112x32xf32>
    %cst_47 = arith.constant 0.000000e+00 : f32
    %65 = vector.broadcast %cst_47 : f32 to vector<112x32xf32>
    %66 = arith.maximumf %64, %65 : vector<112x32xf32>
    %67 = arith.truncf %66 : vector<112x32xf32> to vector<112x32xbf16>
    %c0_48 = arith.constant 0 : index
    %c0_49 = arith.constant 0 : index
    %68 = vector.load %arg20[%c0_48, %c0_49] : memref<32x12xbf16, #tpu.memory_space<vmem>>, vector<32x12xbf16>
    %cst_50 = arith.constant dense<0.000000e+00> : vector<112x12xf32>
    %69 = tpu.matmul %67, %68, %cst_50 {dimension_numbers = #tpu.dot_dimension_numbers<[1], [0], [0], [1], [0, 0, 1, 1], [], []>} : vector<112x32xbf16>, vector<32x12xbf16>, vector<112x12xf32> -> vector<112x12xf32>
    %70 = arith.mulf %13, %69 : vector<112x12xf32>
    %71 = arith.truncf %70 : vector<112x12xf32> to vector<112x12xbf16>
    %72 = arith.truncf %58 : vector<112x32xf32> to vector<112x32xbf16>
    %73 = tpu.concatenate %71, %72 in 1 : vector<112x12xbf16>, vector<112x32xbf16> -> vector<112x44xbf16>
    %c0_51 = arith.constant 0 : index
    %c0_52 = arith.constant 0 : index
    %74 = vector.load %arg3[%c0_51, %c0_52] : memref<16x112xbf16, #tpu.memory_space<vmem>>, vector<16x112xbf16>
    %cst_53 = arith.constant dense<0.000000e+00> : vector<16x44xf32>
    %75 = tpu.matmul %74, %73, %cst_53 {dimension_numbers = #tpu.dot_dimension_numbers<[1], [0], [0], [1], [0, 0, 1, 1], [], []>} : vector<16x112xbf16>, vector<112x44xbf16>, vector<16x44xf32> -> vector<16x44xf32>
    %76 = vector.extract_strided_slice %75 {offsets = [0, 0], sizes = [16, 12], strides = [1, 1]} : vector<16x44xf32> to vector<16x12xf32>
    %77 = vector.extract_strided_slice %75 {offsets = [0, 12], sizes = [16, 32], strides = [1, 1]} : vector<16x44xf32> to vector<16x32xf32>
    %cst_54 = arith.constant 1.000000e+00 : f32
    %78 = vector.broadcast %cst_54 : f32 to vector<16x12xf32>
    %79 = arith.mulf %78, %76 : vector<16x12xf32>
    %c0_55 = arith.constant 0 : index
    %c0_56 = arith.constant 0 : index
    %80 = vector.load %arg4[%c0_55, %c0_56] : memref<16x1xf32, #tpu.memory_space<vmem>>, vector<16x1xf32>
    %81 = vector.broadcast %80 : vector<16x1xf32> to vector<16x12xf32>
    %82 = arith.mulf %79, %81 : vector<16x12xf32>
    %83 = arith.addf %1, %82 : vector<16x12xf32>
    %c0_57 = arith.constant 0 : index
    %c0_58 = arith.constant 0 : index
    %84 = vector.load %arg27[%c0_57, %c0_58] : memref<16x12xf32, #tpu.memory_space<vmem>>, vector<16x12xf32>
    tpu.vector_store %arg27[%c0_57, %c0_58], %83 {strides = array<i32>} : memref<16x12xf32, #tpu.memory_space<vmem>>, vector<16x12xf32>,
    %c0_59 = arith.constant 0 : index
    %c0_60 = arith.constant 0 : index
    %85 = vector.load %arg21[%c0_59, %c0_60] : memref<32x32xbf16, #tpu.memory_space<vmem>>, vector<32x32xbf16>
    %cst_61 = arith.constant dense<0.000000e+00> : vector<16x32xf32>
    %86 = tpu.matmul %2, %85, %cst_61 {dimension_numbers = #tpu.dot_dimension_numbers<[1], [0], [0], [1], [0, 0, 1, 1], [], []>} : vector<16x32xbf16>, vector<32x32xbf16>, vector<16x32xf32> -> vector<16x32xf32>
    %87 = arith.truncf %77 : vector<16x32xf32> to vector<16x32xbf16>
    %c0_62 = arith.constant 0 : index
    %c0_63 = arith.constant 0 : index
    %88 = vector.load %arg22[%c0_62, %c0_63] : memref<32x32xbf16, #tpu.memory_space<vmem>>, vector<32x32xbf16>
    %cst_64 = arith.constant dense<0.000000e+00> : vector<16x32xf32>
    %89 = tpu.matmul %87, %88, %cst_64 {dimension_numbers = #tpu.dot_dimension_numbers<[1], [0], [0], [1], [0, 0, 1, 1], [], []>} : vector<16x32xbf16>, vector<32x32xbf16>, vector<16x32xf32> -> vector<16x32xf32>
    %90 = arith.addf %86, %89 : vector<16x32xf32>
    %c0_65 = arith.constant 0 : index
    %c0_66 = arith.constant 0 : index
    %91 = vector.load %arg23[%c0_65, %c0_66] : memref<1x32xf32, #tpu.memory_space<vmem>>, vector<1x32xf32>
    %92 = vector.broadcast %91 : vector<1x32xf32> to vector<16x32xf32>
    %93 = arith.addf %90, %92 : vector<16x32xf32>
    %cst_67 = arith.constant 0.000000e+00 : f32
    %94 = vector.broadcast %cst_67 : f32 to vector<16x32xf32>
    %95 = arith.maximumf %93, %94 : vector<16x32xf32>
    %96 = arith.truncf %95 : vector<16x32xf32> to vector<16x32xbf16>
    %c0_68 = arith.constant 0 : index
    %c0_69 = arith.constant 0 : index
    %97 = vector.load %arg24[%c0_68, %c0_69] : memref<32x32xbf16, #tpu.memory_space<vmem>>, vector<32x32xbf16>
    %cst_70 = arith.constant dense<0.000000e+00> : vector<16x32xf32>
    %98 = tpu.matmul %96, %97, %cst_70 {dimension_numbers = #tpu.dot_dimension_numbers<[1], [0], [0], [1], [0, 0, 1, 1], [], []>} : vector<16x32xbf16>, vector<32x32xbf16>, vector<16x32xf32> -> vector<16x32xf32>
    %99 = arith.addf %0, %98 : vector<16x32xf32>
    %c0_71 = arith.constant 0 : index
    %c0_72 = arith.constant 0 : index
    %100 = vector.load %arg25[%c0_71, %c0_72] : memref<1x32xf32, #tpu.memory_space<vmem>>, vector<1x32xf32>
    %101 = vector.broadcast %100 : vector<1x32xf32> to vector<16x32xf32>
    %102 = arith.addf %99, %101 : vector<16x32xf32>
    %c0_73 = arith.constant 0 : index
    %c0_74 = arith.constant 0 : index
    %103 = vector.load %arg26[%c0_73, %c0_74] : memref<16x32xf32, #tpu.memory_space<vmem>>, vector<16x32xf32>
    tpu.vector_store %arg26[%c0_73, %c0_74], %102 {strides = array<i32>} : memref<16x32xf32, #tpu.memory_space<vmem>>, vector<16x32xf32>,
    return
  }
  func.func @transform_0(%arg0: i32) -> (i32, i32) {
    %c0_i32 = arith.constant 0 : i32
    %c0_i32_0 = arith.constant 0 : i32
    %c0_i32_1 = arith.constant 0 : i32
    return %c0_i32, %c0_i32_0 : i32, i32
  }
  func.func @transform_1(%arg0: i32) -> (i32, i32) {
    %c0_i32 = arith.constant 0 : i32
    %c0_i32_0 = arith.constant 0 : i32
    %c0_i32_1 = arith.constant 0 : i32
    return %c0_i32, %c0_i32_0 : i32, i32
  }
  func.func @transform_2(%arg0: i32) -> (i32, i32) {
    %c0_i32 = arith.constant 0 : i32
    %c0_i32_0 = arith.constant 0 : i32
    %c0_i32_1 = arith.constant 0 : i32
    return %c0_i32, %c0_i32_0 : i32, i32
  }
  func.func @transform_3(%arg0: i32) -> (i32, i32) {
    %c0_i32 = arith.constant 0 : i32
    %c0_i32_0 = arith.constant 0 : i32
    %c0_i32_1 = arith.constant 0 : i32
    return %c0_i32, %c0_i32_0 : i32, i32
  }
  func.func @transform_4(%arg0: i32) -> (i32, i32) {
    %c0_i32 = arith.constant 0 : i32
    %c0_i32_0 = arith.constant 0 : i32
    %c0_i32_1 = arith.constant 0 : i32
    return %c0_i32, %c0_i32_0 : i32, i32
  }
  func.func @transform_5(%arg0: i32) -> (i32, i32) {
    %c0_i32 = arith.constant 0 : i32
    %c0_i32_0 = arith.constant 0 : i32
    %c0_i32_1 = arith.constant 0 : i32
    return %c0_i32, %c0_i32_0 : i32, i32
  }
  func.func @transform_6(%arg0: i32) -> (i32, i32) {
    %c0_i32 = arith.constant 0 : i32
    %c0_i32_0 = arith.constant 0 : i32
    %c0_i32_1 = arith.constant 0 : i32
    return %c0_i32, %c0_i32_0 : i32, i32
  }
  func.func @transform_7(%arg0: i32) -> (i32, i32) {
    %c0_i32 = arith.constant 0 : i32
    %c0_i32_0 = arith.constant 0 : i32
    %c0_i32_1 = arith.constant 0 : i32
    return %c0_i32, %c0_i32_0 : i32, i32
  }
  func.func @transform_8(%arg0: i32) -> (i32, i32) {
    %c0_i32 = arith.constant 0 : i32
    %c0_i32_0 = arith.constant 0 : i32
    %c0_i32_1 = arith.constant 0 : i32
    return %c0_i32, %c0_i32_0 : i32, i32
  }
  func.func @transform_9(%arg0: i32) -> (i32, i32) {
    %c0_i32 = arith.constant 0 : i32
    %c0_i32_0 = arith.constant 0 : i32
    %c0_i32_1 = arith.constant 0 : i32
    return %c0_i32, %c0_i32_0 : i32, i32
  }
  func.func @transform_10(%arg0: i32) -> (i32, i32) {
    %c0_i32 = arith.constant 0 : i32
    %c0_i32_0 = arith.constant 0 : i32
    %c0_i32_1 = arith.constant 0 : i32
    return %c0_i32, %c0_i32_0 : i32, i32
  }
  func.func @transform_11(%arg0: i32) -> (i32, i32) {
    %c0_i32 = arith.constant 0 : i32
    %c0_i32_0 = arith.constant 0 : i32
    %c0_i32_1 = arith.constant 0 : i32
    return %c0_i32, %c0_i32_0 : i32, i32
  }
  func.func @transform_12(%arg0: i32) -> (i32, i32) {
    %c0_i32 = arith.constant 0 : i32
    %c0_i32_0 = arith.constant 0 : i32
    %c0_i32_1 = arith.constant 0 : i32
    return %c0_i32, %c0_i32_0 : i32, i32
  }
  func.func @transform_13(%arg0: i32) -> (i32, i32) {
    %c0_i32 = arith.constant 0 : i32
    %c0_i32_0 = arith.constant 0 : i32
    %c0_i32_1 = arith.constant 0 : i32
    return %c0_i32, %c0_i32_0 : i32, i32
  }
  func.func @transform_14(%arg0: i32) -> (i32, i32) {
    %c0_i32 = arith.constant 0 : i32
    %c0_i32_0 = arith.constant 0 : i32
    %c0_i32_1 = arith.constant 0 : i32
    return %c0_i32, %c0_i32_0 : i32, i32
  }
  func.func @transform_15(%arg0: i32) -> (i32, i32) {
    %c0_i32 = arith.constant 0 : i32
    %c0_i32_0 = arith.constant 0 : i32
    %c0_i32_1 = arith.constant 0 : i32
    return %c0_i32, %c0_i32_0 : i32, i32
  }
  func.func @transform_16(%arg0: i32) -> (i32, i32) {
    %c0_i32 = arith.constant 0 : i32
    %c0_i32_0 = arith.constant 0 : i32
    %c0_i32_1 = arith.constant 0 : i32
    return %c0_i32, %c0_i32_0 : i32, i32
  }
  func.func @transform_17(%arg0: i32) -> (i32, i32) {
    %c0_i32 = arith.constant 0 : i32
    %c0_i32_0 = arith.constant 0 : i32
    %c0_i32_1 = arith.constant 0 : i32
    return %c0_i32, %c0_i32_0 : i32, i32
  }
  func.func @transform_18(%arg0: i32) -> (i32, i32) {
    %c0_i32 = arith.constant 0 : i32
    %c0_i32_0 = arith.constant 0 : i32
    %c0_i32_1 = arith.constant 0 : i32
    return %c0_i32, %c0_i32_0 : i32, i32
  }
  func.func @transform_19(%arg0: i32) -> (i32, i32) {
    %c0_i32 = arith.constant 0 : i32
    %c0_i32_0 = arith.constant 0 : i32
    %c0_i32_1 = arith.constant 0 : i32
    return %c0_i32, %c0_i32_0 : i32, i32
  }
  func.func @transform_20(%arg0: i32) -> (i32, i32) {
    %c0_i32 = arith.constant 0 : i32
    %c0_i32_0 = arith.constant 0 : i32
    %c0_i32_1 = arith.constant 0 : i32
    return %c0_i32, %c0_i32_0 : i32, i32
  }
  func.func @transform_21(%arg0: i32) -> (i32, i32) {
    %c0_i32 = arith.constant 0 : i32
    %c0_i32_0 = arith.constant 0 : i32
    %c0_i32_1 = arith.constant 0 : i32
    return %c0_i32, %c0_i32_0 : i32, i32
  }
  func.func @transform_22(%arg0: i32) -> (i32, i32) {
    %c0_i32 = arith.constant 0 : i32
    %c0_i32_0 = arith.constant 0 : i32
    %c0_i32_1 = arith.constant 0 : i32
    return %c0_i32, %c0_i32_0 : i32, i32
  }
  func.func @transform_23(%arg0: i32) -> (i32, i32) {
    %c0_i32 = arith.constant 0 : i32
    %c0_i32_0 = arith.constant 0 : i32
    %c0_i32_1 = arith.constant 0 : i32
    return %c0_i32, %c0_i32_0 : i32, i32
  }
  func.func @transform_24(%arg0: i32) -> (i32, i32) {
    %c0_i32 = arith.constant 0 : i32
    %c0_i32_0 = arith.constant 0 : i32
    %c0_i32_1 = arith.constant 0 : i32
    return %c0_i32, %c0_i32_0 : i32, i32
  }
  func.func @transform_25(%arg0: i32) -> (i32, i32) {
    %c0_i32 = arith.constant 0 : i32
    %c0_i32_0 = arith.constant 0 : i32
    %c0_i32_1 = arith.constant 0 : i32
    return %c0_i32, %c0_i32_0 : i32, i32
  }
  func.func @transform_26(%arg0: i32) -> (i32, i32) {
    %c0_i32 = arith.constant 0 : i32
    %c0_i32_0 = arith.constant 0 : i32
    %c0_i32_1 = arith.constant 0 : i32
    return %c0_i32, %c0_i32_0 : i32, i32
  }
}

</mosaic_0001>

<bundles_post_ra>
// kernel: tpu_custom_call.1
= control target key start
LH: loop header
LB: loop body
LE: loop exit
PB: predicated region body
PF: predicated region fallthrough
CT: control target
= control target key end

     0   :  { %s4436_s0 = inlined_call_operand.vmem [shape: bf16[112,16], index: 0, kind: input, shape index: {}]   ;;  %s4437_s1 = inlined_call_operand.vmem [shape: bf16[112,16], index: 1, kind: input, shape index: {}]   ;;  %s4438_s2 = inlined_call_operand.vmem [shape: bf16[16,112], index: 2, kind: input, shape index: {}]   ;;  %s4439_s3 = inlined_call_operand.vmem [shape: f32[16,1], index: 3, kind: input, shape index: {}]   ;;  %s4440_s4 = inlined_call_operand.vmem [shape: f32[16,32], index: 4, kind: input, shape index: {}]   ;;  %s4441_s5 = inlined_call_operand.vmem [shape: f32[16,12], index: 5, kind: input, shape index: {}]   ;;  %s4442_s6 = inlined_call_operand.vmem [shape: bf16[112,4], index: 6, kind: input, shape index: {}]   ;;  %s4443_s7 = inlined_call_operand.vmem [shape: bf16[12,48], index: 7, kind: input, shape index: {}]   ;;  %s4444_s8 = inlined_call_operand.vmem [shape: bf16[12,48], index: 8, kind: input, shape index: {}]   ;;  %s4445_s9 = inlined_call_operand.vmem [shape: bf16[48,16], index: 9, kind: input, shape index: {}]   ;;  %s4446_s10 = inlined_call_operand.vmem [shape: bf16[32,32], index: 10, kind: input, shape index: {}]   ;;  %s4447_s11 = inlined_call_operand.vmem [shape: bf16[32,32], index: 11, kind: input, shape index: {}]   ;;  %s4448_s12 = inlined_call_operand.vmem [shape: bf16[16,32], index: 12, kind: input, shape index: {}]   ;;  %s4449_s13 = inlined_call_operand.vmem [shape: bf16[4,32], index: 13, kind: input, shape index: {}]   ;;  %s4450_s14 = inlined_call_operand.vmem [shape: f32[1,32], index: 14, kind: input, shape index: {}]   ;;  %s4451_s15 = inlined_call_operand.vmem [shape: bf16[32,32], index: 15, kind: input, shape index: {}]   ;;  %s4452_s16 = inlined_call_operand.vmem [shape: f32[1,32], index: 16, kind: input, shape index: {}]   ;;  %s4453_s17 = inlined_call_operand.vmem [shape: bf16[32,32], index: 17, kind: input, shape index: {}]   ;;  %s4454_s18 = inlined_call_operand.vmem [shape: f32[1,32], index: 18, kind: input, shape index: {}]   ;;  %s4455_s19 = inlined_call_operand.vmem [shape: bf16[32,12], index: 19, kind: input, shape index: {}]   ;;  %s4456_s20 = inlined_call_operand.vmem [shape: bf16[32,32], index: 20, kind: input, shape index: {}]   ;;  %s4457_s21 = inlined_call_operand.vmem [shape: bf16[32,32], index: 21, kind: input, shape index: {}]   ;;  %s4458_s22 = inlined_call_operand.vmem [shape: f32[1,32], index: 22, kind: input, shape index: {}]   ;;  %s4459_s23 = inlined_call_operand.vmem [shape: bf16[32,32], index: 23, kind: input, shape index: {}]   ;;  %s4460_s24 = inlined_call_operand.vmem [shape: f32[1,32], index: 24, kind: input, shape index: {}]   ;;  %s4461_s25 = inlined_call_operand.hbm [shape: f32[16,32], index: 25, kind: output, shape index: {0}]   ;;  %s4462_s26 = inlined_call_operand.hbm [shape: f32[16,12], index: 26, kind: output, shape index: {1}]  }
   0x1   :  { %4471 = sst [smem:[#allocation8_spill]] %s4436_s0 }
   0x2   :  { %4472 = sst [smem:[#allocation9_spill]] %s4437_s1 }
   0x3   :  { %4473 = sst [smem:[#allocation10_spill]] %s4438_s2 }
   0x4   :  { %4474 = sst [smem:[#allocation11_spill]] %s4439_s3 }
   0x5   :  { %4475 = sst [smem:[#allocation12_spill]] %s4440_s4 }
   0x6   :  { %4476 = sst [smem:[#allocation13_spill]] %s4441_s5 }
   0x7   :  { %4477 = sst [smem:[#allocation14_spill]] %s4442_s6 }
   0x8   :  { %4478 = sst [smem:[#allocation15_spill]] %s4443_s7 }
   0x9   :  { %4479 = sst [smem:[#allocation16_spill]] %s4444_s8 }
   0xa   :  { %4480 = sst [smem:[#allocation17_spill]] %s4445_s9 }
   0xb   :  { %4481 = sst [smem:[#allocation18_spill]] %s4446_s10 }
   0xc   :  { %32 = vsyncpa [#allocation3], 0  ;;  %s4482_s7 = sld [smem:[#allocation13_spill]]  ;;  %v3262_v3 = vmov 0.0   ;;  %vm3263_vm0 = vmmov 0   ;;  %s3264_s4 = smov 32  }
   0xd   :  { %2709 = vmatprep.subr.bf16.mxu0 %v3262_v3  ;;  %2739 = vmatprep.subr.bf16.mxu1 %v3262_v3 }
   0xe   :  { %2711 = vmatprep.mubr.msk.bf16.mxu0 %vm3263_vm0, %v3262_v3  ;;  %2741 = vmatprep.mubr.msk.bf16.mxu1 %vm3263_vm0, %v3262_v3 }
  0x12   :  { %v87_v0 = vld [vmem:[%s4482_s7] sm:$0xff]  ;;  %v88_v1 = vld [vmem:[%s4482_s7 + $0x8] sm:$0xff] }
  0x13   :  { %v90_v2 = vpack.c.bf16 %v88_v1, %v87_v0 }
  0x15   :  { %92 = vrot.lane.b32.xlu0 %v90_v2, %s3264_s4 }
  0x16   :  { %33 = vsyncpa [#allocation5], 0  ;;  %s4483_s9 = sld [smem:[#allocation12_spill]]  ;;  %vm94_vm1 = vcmask 261120   ;;  %s4484_s6 = sld [smem:[#allocation8_spill]]  ;;  %vm148_vm2 = vcmask 130048  }
  0x17   :  { %s4485_s3 = sld [smem:[#allocation9_spill]]  ;;  %s4486_s5 = sld [smem:[#allocation15_spill]]  ;;  %vm489_vm3 = vcmask 1045504   ;;  %vm467_vm4 = vcmask 97280   ;;  %vm726_vm5 = vcmask 392192   ;;  %vm1412_vm6 = vcmask 1041408  }
  0x18   :  { %s4487_s1 = sld [smem:[#allocation16_spill]]  ;;  %s4488_s0 = sld [smem:[#allocation17_spill]]  ;;  %vm1390_vm7 = vcmask 31744   ;;  %vm2149_vm8 = vcmask 916480  }
  0x19   :  { %s4489_s28 = sld [smem:[#allocation18_spill]] }
  0x1a   :  { %s4492_s10 = sld [smem:[#allocation10_spill]] }
  0x1c   :  { %v85_v4 = vld [vmem:[%s4483_s9] sm:$0xff]  ;;  %v86_v5 = vld [vmem:[%s4483_s9 + $0x8] sm:$0xff]  ;;  %v3142_v13 = vld [vmem:[%s4484_s6 + $0x10] sm:$0xff]  }
  0x1d   :  { %v3427_v6 = vpack.c.bf16 %v86_v5, %v85_v4  ;;  %v3138_v9 = vld [vmem:[%s4484_s6] sm:$0xff]   ;;  %v3140_v11 = vld [vmem:[%s4484_s6 + $0x8] sm:$0xff]   ;;  %v3143_v14 = vld [vmem:[%s4485_s3 + $0x10] sm:$0xff]  }
  0x1e   :  { %v3139_v10 = vld [vmem:[%s4485_s3] sm:$0xff]   ;;  %v3141_v12 = vld [vmem:[%s4485_s3 + $0x8] sm:$0xff]   ;;  %v3144_v15 = vld [vmem:[%s4484_s6 + $0x18] sm:$0xff]  }
  0x1f   :  { %v3145_v16 = vld [vmem:[%s4485_s3 + $0x18] sm:$0xff]   ;;  %v3146_v17 = vld [vmem:[%s4484_s6 + $0x20] sm:$0xff]   ;;  %v3148_v19 = vld [vmem:[%s4484_s6 + $0x28] sm:$0xff]  }
  0x20   :  { %v3147_v18 = vld [vmem:[%s4485_s3 + $0x20] sm:$0xff]   ;;  %v3149_v20 = vld [vmem:[%s4485_s3 + $0x28] sm:$0xff]   ;;  %v3150_v21 = vld [vmem:[%s4484_s6 + $0x30] sm:$0xff]   ;;  %s4490_s6 = sld [smem:[#allocation14_spill]] }
  0x21   :  { %v3151_v22 = vld [vmem:[%s4485_s3 + $0x30] sm:$0xff]   ;;  %v3152_v23 = vld [vmem:[%s4486_s5] sm:$0x3f]   ;;  %s3265_s3 = smov 96  }
  0x22   :  { %v3153_v24 = vld [vmem:[%s4487_s1] sm:$0x3f]   ;;  %v491_v25 = vsel %vm489_vm3, %v3152_v23, 0 }
  0x23   :  { %v590_v26 = vsel %vm489_vm3, %v3153_v24, 0 }
  0x87   :  { %v93_v7 = vpop.permute.xlu0 %92 }
  0x88   :  { %v97_v8 = vsel %vm94_vm1, %v3427_v6, %v93_v7 }
  0x89   :  { %2710 = vmatpush3.bf16.msra.mxu0 %v97_v8  ;;  %2740 = vmatpush3.bf16.msra.mxu1 %v97_v8 }
  0x8a   :  { %2769 = vmatprep.subr.bf16.mxu0 %v3262_v3  ;;  %2799 = vmatprep.subr.bf16.mxu1 %v3262_v3 }
  0x8c   :  { %2712 = vmatmul.mubr.msk.bf16.vlgmr.msra.gmra.mrb[0].mxu0 %vm148_vm2, %v3138_v9  ;;  %2742 = vmatmul.mubr.msk.bf16.vlgmr.msra.gmra.mrb[0].mxu1 %vm148_vm2, %v3139_v10 }
  0x8d   :  { %2715 = vmatprep.mubr.msk.bf16.mxu0 %vm3263_vm0, %v3262_v3  ;;  %2745 = vmatprep.mubr.msk.bf16.mxu1 %vm3263_vm0, %v3262_v3 }
  0x8e   :  { %2770 = vmatpush3.bf16.msra.mxu0 %v491_v25  ;;  %2800 = vmatpush3.bf16.msra.mxu1 %v590_v26 }
  0x8f   :  { %2863 = vmatprep.subr.bf16.mxu1 %v3262_v3  ;;  %2829 = vmatprep.subr.bf16.mxu0 %v3262_v3 }
  0x94   :  { %2716 = vmatmul.mubr.msk.bf16.gmra.mrb[4].mxu0 %vm148_vm2, %v3140_v11  ;;  %2746 = vmatmul.mubr.msk.bf16.gmra.mrb[4].mxu1 %vm148_vm2, %v3141_v12 }
  0x95   :  { %2719 = vmatprep.mubr.msk.bf16.mxu0 %vm3263_vm0, %v3262_v3  ;;  %2749 = vmatprep.mubr.msk.bf16.mxu1 %vm3263_vm0, %v3262_v3 }
  0x9c   :  { %2720 = vmatmul.mubr.msk.bf16.gmra.mrb[8].mxu0 %vm148_vm2, %v3142_v13  ;;  %2750 = vmatmul.mubr.msk.bf16.gmra.mrb[8].mxu1 %vm148_vm2, %v3143_v14 }
  0x9d   :  { %2723 = vmatprep.mubr.msk.bf16.mxu0 %vm3263_vm0, %v3262_v3  ;;  %2753 = vmatprep.mubr.msk.bf16.mxu1 %vm3263_vm0, %v3262_v3 }
  0xa4   :  { %2724 = vmatmul.mubr.msk.bf16.gmra.mrb[12].mxu0 %vm148_vm2, %v3144_v15  ;;  %2754 = vmatmul.mubr.msk.bf16.gmra.mrb[12].mxu1 %vm148_vm2, %v3145_v16 }
  0xa5   :  { %2727 = vmatprep.mubr.msk.bf16.mxu0 %vm3263_vm0, %v3262_v3  ;;  %2757 = vmatprep.mubr.msk.bf16.mxu1 %vm3263_vm0, %v3262_v3 }
  0xac   :  { %2728 = vmatmul.mubr.msk.bf16.gmra.mrb[16].mxu0 %vm148_vm2, %v3146_v17  ;;  %2758 = vmatmul.mubr.msk.bf16.gmra.mrb[16].mxu1 %vm148_vm2, %v3147_v18 }
  0xad   :  { %2731 = vmatprep.mubr.msk.bf16.mxu0 %vm3263_vm0, %v3262_v3  ;;  %2761 = vmatprep.mubr.msk.bf16.mxu1 %vm3263_vm0, %v3262_v3 }
  0xb4   :  { %2732 = vmatmul.mubr.msk.bf16.gmra.mrb[20].mxu0 %vm148_vm2, %v3148_v19  ;;  %2762 = vmatmul.mubr.msk.bf16.gmra.mrb[20].mxu1 %vm148_vm2, %v3149_v20 }
  0xb5   :  { %2735 = vmatprep.mubr.msk.bf16.mxu0 %vm3263_vm0, %v3262_v3  ;;  %2765 = vmatprep.mubr.msk.bf16.mxu1 %vm3263_vm0, %v3262_v3 }
  0xbc   :  { %2736 = vmatmul.mubr.msk.bf16.gmra.mrb[24].mxu0 %vm148_vm2, %v3150_v21  ;;  %2766 = vmatmul.mubr.msk.bf16.gmra.mrb[24].mxu1 %vm148_vm2, %v3151_v22 }
  0xbd   :  { %2771 = vmatprep.mubr.msk.bf16.mxu0 %vm3263_vm0, %v3262_v3  ;;  %2801 = vmatprep.mubr.msk.bf16.mxu1 %vm3263_vm0, %v3262_v3 }
 0x15f   :  { %v3525_v27 = vpop.f32.mrb[0].mxu0  ;;  %v3527_v28 = vpop.f32.mrb[0].mxu1 }
 0x160   :  { %v3531_v29 = vsub.f32 %v3525_v27, %v3527_v28  ;;  %v2713_v30 = vpop.f32.mrb[1].mxu0  ;;  %v2743_v31 = vpop.f32.mrb[1].mxu1 }
 0x161   :  { %v3533_v32 = vpop.f32.mrb[2].mxu0  ;;  %v3535_v33 = vpop.f32.mrb[2].mxu1 }
 0x162   :  { %v935_v34 = vpack.c.bf16 %v3533_v32, %v3525_v27  ;;  %v3541_v35 = vsub.f32 %v3533_v32, %v3535_v33  ;;  %v946_v36 = vpack.c.bf16 %v3535_v33, %v3527_v28  ;;  %v2714_v37 = vpop.f32.mrb[3].mxu0  ;;  %v2744_v38 = vpop.f32.mrb[3].mxu1 }
 0x164   :  { %v432_v39 = vpack.c.bf16 %v3541_v35, %v3531_v29 }
 0x166   :  { %448 = vrot.lane.b32.xlu0 %v432_v39, %s3265_s3 }
 0x167   :  { %v3548_v40 = vpop.f32.mrb[4].mxu0  ;;  %v3550_v41 = vpop.f32.mrb[4].mxu1 }
 0x168   :  { %v3554_v42 = vsub.f32 %v3548_v40, %v3550_v41  ;;  %v2717_v43 = vpop.f32.mrb[5].mxu0  ;;  %v2747_v44 = vpop.f32.mrb[5].mxu1 }
 0x169   :  { %v3556_v45 = vpop.f32.mrb[6].mxu0  ;;  %v3558_v46 = vpop.f32.mrb[6].mxu1 }
 0x16a   :  { %v936_v47 = vpack.c.bf16 %v3556_v45, %v3548_v40  ;;  %v3564_v48 = vsub.f32 %v3556_v45, %v3558_v46  ;;  %v947_v49 = vpack.c.bf16 %v3558_v46, %v3550_v41  ;;  %v2718_v50 = vpop.f32.mrb[7].mxu0  ;;  %v2748_v51 = vpop.f32.mrb[7].mxu1 }
 0x16c   :  { %v433_v52 = vpack.c.bf16 %v3564_v48, %v3554_v42 }
 0x16e   :  { %450 = vrot.lane.b32.xlu1 %v433_v52, %s3265_s3 }
 0x16f   :  { %v3571_v53 = vpop.f32.mrb[8].mxu0  ;;  %v3573_v54 = vpop.f32.mrb[8].mxu1 }
 0x170   :  { %v3577_v55 = vsub.f32 %v3571_v53, %v3573_v54  ;;  %v2721_v56 = vpop.f32.mrb[9].mxu0  ;;  %v2751_v57 = vpop.f32.mrb[9].mxu1 }
 0x171   :  { %v3579_v58 = vpop.f32.mrb[10].mxu0  ;;  %v3581_v59 = vpop.f32.mrb[10].mxu1 }
 0x172   :  { %v937_v60 = vpack.c.bf16 %v3579_v58, %v3571_v53  ;;  %v3587_v61 = vsub.f32 %v3579_v58, %v3581_v59  ;;  %v948_v62 = vpack.c.bf16 %v3581_v59, %v3573_v54  ;;  %v2722_v63 = vpop.f32.mrb[11].mxu0  ;;  %v2752_v0 = vpop.f32.mrb[11].mxu1 }
 0x174   :  { %v434_v1 = vpack.c.bf16 %v3587_v61, %v3577_v55 }
 0x176   :  { %452 = vrot.lane.b32.xlu1 %v434_v1, %s3265_s3 }
 0x177   :  { %v3594_v2 = vpop.f32.mrb[12].mxu0  ;;  %v3596_v4 = vpop.f32.mrb[12].mxu1 }
 0x178   :  { %v3600_v5 = vsub.f32 %v3594_v2, %v3596_v4  ;;  %v2725_v7 = vpop.f32.mrb[13].mxu0  ;;  %v2755_v8 = vpop.f32.mrb[13].mxu1 }
 0x179   :  { %v3602_v9 = vpop.f32.mrb[14].mxu0  ;;  %v3604_v10 = vpop.f32.mrb[14].mxu1 }
 0x17a   :  { %v938_v11 = vpack.c.bf16 %v3602_v9, %v3594_v2  ;;  %v3610_v12 = vsub.f32 %v3602_v9, %v3604_v10  ;;  %v949_v13 = vpack.c.bf16 %v3604_v10, %v3596_v4  ;;  %v2726_v14 = vpop.f32.mrb[15].mxu0  ;;  %v2756_v15 = vpop.f32.mrb[15].mxu1  ;;  %v3159_v10 = vld [vmem:[%s4489_s28] sm:$0xff]  }
 0x17c   :  { %v435_v16 = vpack.c.bf16 %v3610_v12, %v3600_v5 }
 0x17e   :  { %454 = vrot.lane.b32.xlu0 %v435_v16, %s3265_s3 }
 0x17f   :  { %v3617_v17 = vpop.f32.mrb[16].mxu0  ;;  %v3619_v18 = vpop.f32.mrb[16].mxu1 }
 0x180   :  { %v3623_v19 = vsub.f32 %v3617_v17, %v3619_v18  ;;  %v2729_v20 = vpop.f32.mrb[17].mxu0  ;;  %v2759_v21 = vpop.f32.mrb[17].mxu1 }
 0x181   :  { %v3625_v22 = vpop.f32.mrb[18].mxu0  ;;  %v3627_v23 = vpop.f32.mrb[18].mxu1 }
 0x182   :  { %v939_v24 = vpack.c.bf16 %v3625_v22, %v3617_v17  ;;  %v3633_v25 = vsub.f32 %v3625_v22, %v3627_v23  ;;  %v950_v26 = vpack.c.bf16 %v3627_v23, %v3619_v18  ;;  %v2730_v30 = vpop.f32.mrb[19].mxu0  ;;  %v2760_v31 = vpop.f32.mrb[19].mxu1 }
 0x184   :  { %v436_v37 = vpack.c.bf16 %v3633_v25, %v3623_v19 }
 0x186   :  { %456 = vrot.lane.b32.xlu1 %v436_v37, %s3265_s3 }
 0x187   :  { %v3640_v38 = vpop.f32.mrb[20].mxu0  ;;  %v3642_v39 = vpop.f32.mrb[20].mxu1 }
 0x188   :  { %v3646_v43 = vsub.f32 %v3640_v38, %v3642_v39  ;;  %v2733_v44 = vpop.f32.mrb[21].mxu0  ;;  %v2763_v50 = vpop.f32.mrb[21].mxu1 }
 0x189   :  { %v3648_v51 = vpop.f32.mrb[22].mxu0  ;;  %v3650_v52 = vpop.f32.mrb[22].mxu1 }
 0x18a   :  { %v940_v56 = vpack.c.bf16 %v3648_v51, %v3640_v38  ;;  %v3656_v57 = vsub.f32 %v3648_v51, %v3650_v52  ;;  %v951_v63 = vpack.c.bf16 %v3650_v52, %v3642_v39  ;;  %v2734_v0 = vpop.f32.mrb[23].mxu0  ;;  %v2764_v1 = vpop.f32.mrb[23].mxu1  ;;  %v3161_v38 = vld [vmem:[%s4448_s12] sm:$0xff]  }
 0x18b   :  { %v1354_v51 = vld [vmem:[%s4449_s13] sm:$0x3]  ;;  %s4491_s13 = sld [smem:[#allocation11_spill]] }
 0x18c   :  { %v437_v7 = vpack.c.bf16 %v3656_v57, %v3646_v43 }
 0x18e   :  { %458 = vrot.lane.b32.xlu0 %v437_v7, %s3265_s3  ;;  %v3154_v7 = vld [vmem:[%s4447_s11] sm:$0xff]  }
 0x18f   :  { %v3663_v8 = vpop.f32.mrb[24].mxu0  ;;  %v3665_v14 = vpop.f32.mrb[24].mxu1 }
 0x190   :  { %v3669_v15 = vsub.f32 %v3663_v8, %v3665_v14  ;;  %v2737_v16 = vpop.f32.mrb[25].mxu0  ;;  %v2767_v20 = vpop.f32.mrb[25].mxu1 }
 0x191   :  { %v3671_v21 = vpop.f32.mrb[26].mxu0  ;;  %v3673_v30 = vpop.f32.mrb[26].mxu1  ;;  %v3156_v16 = vld [vmem:[%s4488_s0] sm:$0xff]  }
 0x192   :  { %v941_v31 = vpack.c.bf16 %v3671_v21, %v3663_v8  ;;  %v3679_v37 = vsub.f32 %v3671_v21, %v3673_v30  ;;  %v952_v44 = vpack.c.bf16 %v3673_v30, %v3665_v14  ;;  %v2738_v50 = vpop.f32.mrb[27].mxu0  ;;  %v2768_v0 = vpop.f32.mrb[27].mxu1 }
 0x193   :  { %v3155_v50 = vld [vmem:[%s4447_s11 + $0x8] sm:$0xff]  }
 0x194   :  { %v438_v1 = vpack.c.bf16 %v3679_v37, %v3669_v15  ;;  %v3157_v0 = vld [vmem:[%s4488_s0 + $0x8] sm:$0xff]  }
 0x196   :  { %460 = vrot.lane.b32.xlu1 %v438_v1, %s3265_s3  ;;  %v3158_v1 = vld [vmem:[%s4488_s0 + $0x10] sm:$0xff]  }
 0x1d8   :  { %v449_v20 = vpop.permute.xlu0 %448 }
 0x1d9   :  { %2772 = vmatmul.mubr.msk.bf16.vlgmr.msra.gmra.mrb[28].mxu0 %vm467_vm4, %v449_v20  ;;  %2802 = vmatmul.mubr.msk.bf16.vlgmr.msra.gmra.mrb[28].mxu1 %vm467_vm4, %v449_v20 }
 0x1da   :  { %2775 = vmatprep.mubr.msk.bf16.mxu0 %vm3263_vm0, %v3262_v3  ;;  %2805 = vmatprep.mubr.msk.bf16.mxu1 %vm3263_vm0, %v3262_v3 }
 0x1db   :  { %2864 = vmatpush3.bf16.msra.mxu1 %v3154_v7  ;;  %2830 = vmatpush3.bf16.msra.mxu0 %v3156_v16 }
 0x1dc   :  { %2865 = vmatprep.subr.bf16.mxu1 %v3262_v3  ;;  %2831 = vmatprep.subr.bf16.mxu0 %v3262_v3 }
 0x1df   :  { %2866 = vmatpush3.bf16.msra.mxu1 %v3155_v50  ;;  %2832 = vmatpush3.bf16.msra.mxu0 %v3157_v0 }
 0x1e0   :  { %v451_v7 = vpop.permute.xlu1 %450  ;;  %2833 = vmatprep.subr.bf16.mxu0 %v3262_v3  ;;  %2927 = vmatprep.subr.bf16.mxu1 %v3262_v3 }
 0x1e1   :  { %2776 = vmatmul.mubr.msk.bf16.gmra.mrb[32].mxu0 %vm467_vm4, %v451_v7  ;;  %2806 = vmatmul.mubr.msk.bf16.gmra.mrb[32].mxu1 %vm467_vm4, %v451_v7 }
 0x1e2   :  { %2779 = vmatprep.mubr.msk.bf16.mxu0 %vm3263_vm0, %v3262_v3  ;;  %2809 = vmatprep.mubr.msk.bf16.mxu1 %vm3263_vm0, %v3262_v3 }
 0x1e3   :  { %2834 = vmatpush3.bf16.msra.mxu0 %v3158_v1 }
 0x1e4   :  { %2895 = vmatprep.subr.bf16.mxu0 %v3262_v3 }
 0x1e8   :  { %v453_v16 = vpop.permute.xlu1 %452 }
 0x1e9   :  { %2780 = vmatmul.mubr.msk.bf16.gmra.mrb[36].mxu0 %vm467_vm4, %v453_v16  ;;  %2810 = vmatmul.mubr.msk.bf16.gmra.mrb[36].mxu1 %vm467_vm4, %v453_v16 }
 0x1ea   :  { %2783 = vmatprep.mubr.msk.bf16.mxu0 %vm3263_vm0, %v3262_v3  ;;  %2813 = vmatprep.mubr.msk.bf16.mxu1 %vm3263_vm0, %v3262_v3 }
 0x1f0   :  { %v455_v20 = vpop.permute.xlu0 %454 }
 0x1f1   :  { %2784 = vmatmul.mubr.msk.bf16.gmra.mrb[40].mxu0 %vm467_vm4, %v455_v20  ;;  %2814 = vmatmul.mubr.msk.bf16.gmra.mrb[40].mxu1 %vm467_vm4, %v455_v20 }
 0x1f2   :  { %2787 = vmatprep.mubr.msk.bf16.mxu0 %vm3263_vm0, %v3262_v3  ;;  %2817 = vmatprep.mubr.msk.bf16.mxu1 %vm3263_vm0, %v3262_v3 }
 0x1f8   :  { %v457_v50 = vpop.permute.xlu1 %456 }
 0x1f9   :  { %2788 = vmatmul.mubr.msk.bf16.gmra.mrb[44].mxu0 %vm467_vm4, %v457_v50  ;;  %2818 = vmatmul.mubr.msk.bf16.gmra.mrb[44].mxu1 %vm467_vm4, %v457_v50 }
 0x1fa   :  { %2791 = vmatprep.mubr.msk.bf16.mxu0 %vm3263_vm0, %v3262_v3  ;;  %2821 = vmatprep.mubr.msk.bf16.mxu1 %vm3263_vm0, %v3262_v3 }
 0x200   :  { %v459_v0 = vpop.permute.xlu0 %458 }
 0x201   :  { %2792 = vmatmul.mubr.msk.bf16.gmra.mrb[48].mxu0 %vm467_vm4, %v459_v0  ;;  %2822 = vmatmul.mubr.msk.bf16.gmra.mrb[48].mxu1 %vm467_vm4, %v459_v0 }
 0x202   :  { %2795 = vmatprep.mubr.msk.bf16.mxu0 %vm3263_vm0, %v3262_v3  ;;  %2825 = vmatprep.mubr.msk.bf16.mxu1 %vm3263_vm0, %v3262_v3 }
 0x208   :  { %v461_v1 = vpop.permute.xlu1 %460 }
 0x209   :  { %2796 = vmatmul.mubr.msk.bf16.gmra.mrb[52].mxu0 %vm467_vm4, %v461_v1  ;;  %2826 = vmatmul.mubr.msk.bf16.gmra.mrb[52].mxu1 %vm467_vm4, %v461_v1 }
 0x20a   :  { %2867 = vmatprep.mubr.msk.bf16.mxu1 %vm3263_vm0, %v3262_v3  ;;  %2835 = vmatprep.mubr.msk.bf16.mxu0 %vm3263_vm0, %v3262_v3 }
 0x211   :  { %2868 = vmatmul.mubr.msk.bf16.vlgmr.msra.gmra.mrb[56].mxu1 %vm94_vm1, %v946_v36 }
 0x212   :  { %2871 = vmatprep.mubr.msk.bf16.mxu1 %vm3263_vm0, %v3262_v3  ;;  %2928 = vmatpush3.bf16.msra.mxu1 %v3161_v38 }
 0x213   :  { %2987 = vmatprep.subr.bf16.mxu1 %v3262_v3 }
 0x219   :  { %2872 = vmatmul.mubr.msk.bf16.gmra.mrb[60].mxu1 %vm94_vm1, %v947_v49 }
 0x21a   :  { %2875 = vmatprep.mubr.msk.bf16.mxu1 %vm3263_vm0, %v3262_v3 }
 0x221   :  { %2876 = vmatmul.mubr.msk.bf16.gmra.mrb[64].mxu1 %vm94_vm1, %v948_v62 }
 0x222   :  { %2879 = vmatprep.mubr.msk.bf16.mxu1 %vm3263_vm0, %v3262_v3 }
 0x229   :  { %2880 = vmatmul.mubr.msk.bf16.gmra.mrb[68].mxu1 %vm94_vm1, %v949_v13 }
 0x22a   :  { %2883 = vmatprep.mubr.msk.bf16.mxu1 %vm3263_vm0, %v3262_v3 }
 0x231   :  { %2884 = vmatmul.mubr.msk.bf16.gmra.mrb[72].mxu1 %vm94_vm1, %v950_v26  ;;  %v3160_v26 = vld [vmem:[%s4489_s28 + $0x8] sm:$0xff]  }
 0x232   :  { %2887 = vmatprep.mubr.msk.bf16.mxu1 %vm3263_vm0, %v3262_v3 }
 0x239   :  { %2888 = vmatmul.mubr.msk.bf16.gmra.mrb[76].mxu1 %vm94_vm1, %v951_v63 }
 0x23a   :  { %2891 = vmatprep.mubr.msk.bf16.mxu1 %vm3263_vm0, %v3262_v3 }
 0x241   :  { %2892 = vmatmul.mubr.msk.bf16.gmra.mrb[80].mxu1 %vm94_vm1, %v952_v44 }
 0x242   :  { %2929 = vmatprep.mubr.msk.bf16.mxu1 %vm3263_vm0, %v3262_v3 }
 0x2ac   :  { %v527_v28 = vpop.f32.mrb[28].mxu0  ;;  %v626_v33 = vpop.f32.mrb[28].mxu1 }
 0x2ad   :  { %v681_v36 = vmul.f32 %v626_v33, %v527_v28  ;;  %v2773_v41 = vpop.f32.mrb[29].mxu0  ;;  %v2803_v46 = vpop.f32.mrb[29].mxu1 }
 0x2ae   :  { %v530_v49 = vpop.f32.mrb[30].mxu0  ;;  %v629_v54 = vpop.f32.mrb[30].mxu1 }
 0x2af   :  { %v682_v59 = vmul.f32 %v629_v54, %v530_v49  ;;  %v2774_v62 = vpop.f32.mrb[31].mxu0  ;;  %v2804_v4 = vpop.f32.mrb[31].mxu1 }
 0x2b1   :  { %v695_v13 = vpack.c.bf16 %v682_v59, %v681_v36 }
 0x2b3   :  { %2836 = vmatmul.mubr.msk.bf16.vlgmr.msra.gmra.mrb[56].mxu0 %vm726_vm5, %v695_v13 }
 0x2b4   :  { %v535_v18 = vpop.f32.mrb[32].mxu0  ;;  %v634_v23 = vpop.f32.mrb[32].mxu1  ;;  %2839 = vmatprep.mubr.msk.bf16.mxu0 %vm3263_vm0, %v3262_v3  ;;  %2896 = vmatpush3.bf16.msra.mxu0 %v3159_v10 }
 0x2b5   :  { %v683_v39 = vmul.f32 %v634_v23, %v535_v18  ;;  %v2777_v52 = vpop.f32.mrb[33].mxu0  ;;  %v2807_v63 = vpop.f32.mrb[33].mxu1  ;;  %2897 = vmatprep.subr.bf16.mxu0 %v3262_v3 }
 0x2b6   :  { %v538_v14 = vpop.f32.mrb[34].mxu0  ;;  %v637_v30 = vpop.f32.mrb[34].mxu1 }
 0x2b7   :  { %v684_v44 = vmul.f32 %v637_v30, %v538_v14  ;;  %v2778_v7 = vpop.f32.mrb[35].mxu0  ;;  %v2808_v16 = vpop.f32.mrb[35].mxu1 }
 0x2b8   :  { %2898 = vmatpush3.bf16.msra.mxu0 %v3160_v26 }
 0x2b9   :  { %v696_v20 = vpack.c.bf16 %v684_v44, %v683_v39  ;;  %2957 = vmatprep.subr.bf16.mxu0 %v3262_v3 }
 0x2bb   :  { %2840 = vmatmul.mubr.msk.bf16.gmra.mrb[60].mxu0 %vm726_vm5, %v696_v20 }
 0x2bc   :  { %v543_v50 = vpop.f32.mrb[36].mxu0  ;;  %v642_v0 = vpop.f32.mrb[36].mxu1  ;;  %2843 = vmatprep.mubr.msk.bf16.mxu0 %vm3263_vm0, %v3262_v3 }
 0x2bd   :  { %v685_v1 = vmul.f32 %v642_v0, %v543_v50  ;;  %v2781_v28 = vpop.f32.mrb[37].mxu0  ;;  %v2811_v33 = vpop.f32.mrb[37].mxu1 }
 0x2be   :  { %v546_v36 = vpop.f32.mrb[38].mxu0  ;;  %v645_v41 = vpop.f32.mrb[38].mxu1 }
 0x2bf   :  { %v686_v46 = vmul.f32 %v645_v41, %v546_v36  ;;  %v2782_v49 = vpop.f32.mrb[39].mxu0  ;;  %v2812_v54 = vpop.f32.mrb[39].mxu1 }
 0x2c1   :  { %v697_v59 = vpack.c.bf16 %v686_v46, %v685_v1 }
 0x2c3   :  { %2844 = vmatmul.mubr.msk.bf16.gmra.mrb[64].mxu0 %vm726_vm5, %v697_v59 }
 0x2c4   :  { %v551_v62 = vpop.f32.mrb[40].mxu0  ;;  %v650_v4 = vpop.f32.mrb[40].mxu1  ;;  %2847 = vmatprep.mubr.msk.bf16.mxu0 %vm3263_vm0, %v3262_v3 }
 0x2c5   :  { %v687_v10 = vmul.f32 %v650_v4, %v551_v62  ;;  %v2785_v13 = vpop.f32.mrb[41].mxu0  ;;  %v2815_v18 = vpop.f32.mrb[41].mxu1 }
 0x2c6   :  { %v554_v23 = vpop.f32.mrb[42].mxu0  ;;  %v653_v26 = vpop.f32.mrb[42].mxu1 }
 0x2c7   :  { %v688_v39 = vmul.f32 %v653_v26, %v554_v23  ;;  %v2786_v52 = vpop.f32.mrb[43].mxu0  ;;  %v2816_v63 = vpop.f32.mrb[43].mxu1 }
 0x2c9   :  { %v698_v14 = vpack.c.bf16 %v688_v39, %v687_v10 }
 0x2cb   :  { %2848 = vmatmul.mubr.msk.bf16.gmra.mrb[68].mxu0 %vm726_vm5, %v698_v14 }
 0x2cc   :  { %v559_v30 = vpop.f32.mrb[44].mxu0  ;;  %v658_v44 = vpop.f32.mrb[44].mxu1  ;;  %2851 = vmatprep.mubr.msk.bf16.mxu0 %vm3263_vm0, %v3262_v3 }
 0x2cd   :  { %v689_v7 = vmul.f32 %v658_v44, %v559_v30  ;;  %v2789_v16 = vpop.f32.mrb[45].mxu0  ;;  %v2819_v20 = vpop.f32.mrb[45].mxu1 }
 0x2ce   :  { %v562_v50 = vpop.f32.mrb[46].mxu0  ;;  %v661_v0 = vpop.f32.mrb[46].mxu1 }
 0x2cf   :  { %v690_v1 = vmul.f32 %v661_v0, %v562_v50  ;;  %v2790_v28 = vpop.f32.mrb[47].mxu0  ;;  %v2820_v33 = vpop.f32.mrb[47].mxu1 }
 0x2d1   :  { %v699_v36 = vpack.c.bf16 %v690_v1, %v689_v7 }
 0x2d3   :  { %2852 = vmatmul.mubr.msk.bf16.gmra.mrb[72].mxu0 %vm726_vm5, %v699_v36 }
 0x2d4   :  { %v567_v41 = vpop.f32.mrb[48].mxu0  ;;  %v666_v46 = vpop.f32.mrb[48].mxu1  ;;  %2855 = vmatprep.mubr.msk.bf16.mxu0 %vm3263_vm0, %v3262_v3 }
 0x2d5   :  { %v691_v49 = vmul.f32 %v666_v46, %v567_v41  ;;  %v2793_v54 = vpop.f32.mrb[49].mxu0  ;;  %v2823_v59 = vpop.f32.mrb[49].mxu1 }
 0x2d6   :  { %v570_v62 = vpop.f32.mrb[50].mxu0  ;;  %v669_v4 = vpop.f32.mrb[50].mxu1 }
 0x2d7   :  { %v692_v10 = vmul.f32 %v669_v4, %v570_v62  ;;  %v2794_v13 = vpop.f32.mrb[51].mxu0  ;;  %v2824_v18 = vpop.f32.mrb[51].mxu1 }
 0x2d9   :  { %v700_v23 = vpack.c.bf16 %v692_v10, %v691_v49 }
 0x2db   :  { %2856 = vmatmul.mubr.msk.bf16.gmra.mrb[76].mxu0 %vm726_vm5, %v700_v23 }
 0x2dc   :  { %v575_v26 = vpop.f32.mrb[52].mxu0  ;;  %v674_v39 = vpop.f32.mrb[52].mxu1  ;;  %2859 = vmatprep.mubr.msk.bf16.mxu0 %vm3263_vm0, %v3262_v3 }
 0x2dd   :  { %v693_v52 = vmul.f32 %v674_v39, %v575_v26  ;;  %v2797_v63 = vpop.f32.mrb[53].mxu0  ;;  %v2827_v14 = vpop.f32.mrb[53].mxu1 }
 0x2de   :  { %v578_v30 = vpop.f32.mrb[54].mxu0  ;;  %v677_v44 = vpop.f32.mrb[54].mxu1 }
 0x2df   :  { %v694_v7 = vmul.f32 %v677_v44, %v578_v30  ;;  %v2798_v16 = vpop.f32.mrb[55].mxu0  ;;  %v2828_v20 = vpop.f32.mrb[55].mxu1 }
 0x2e1   :  { %v701_v50 = vpack.c.bf16 %v694_v7, %v693_v52 }
 0x2e3   :  { %2860 = vmatmul.mubr.msk.bf16.gmra.mrb[80].mxu0 %vm726_vm5, %v701_v50 }
 0x2e4   :  { %v3817_v0 = vpop.f32.mrb[56].mxu1  ;;  %2899 = vmatprep.mubr.msk.bf16.mxu0 %vm3263_vm0, %v3262_v3 }
 0x2e5   :  { %v2869_v1 = vpop.f32.mrb[57].mxu1 }
 0x2e6   :  { %v3821_v28 = vpop.f32.mrb[58].mxu1 }
 0x2e7   :  { %v2870_v33 = vpop.f32.mrb[59].mxu1 }
 0x2eb   :  { %2900 = vmatmul.mubr.msk.bf16.vlgmr.msra.gmra.mrb[84].mxu0 %vm94_vm1, %v935_v34 }
 0x2ec   :  { %v3827_v36 = vpop.f32.mrb[60].mxu1  ;;  %2903 = vmatprep.mubr.msk.bf16.mxu0 %vm3263_vm0, %v3262_v3 }
 0x2ed   :  { %v2873_v41 = vpop.f32.mrb[61].mxu1 }
 0x2ee   :  { %v3831_v46 = vpop.f32.mrb[62].mxu1 }
 0x2ef   :  { %v2874_v49 = vpop.f32.mrb[63].mxu1 }
 0x2f3   :  { %2904 = vmatmul.mubr.msk.bf16.gmra.mrb[88].mxu0 %vm94_vm1, %v936_v47 }
 0x2f4   :  { %v3837_v54 = vpop.f32.mrb[64].mxu1  ;;  %2907 = vmatprep.mubr.msk.bf16.mxu0 %vm3263_vm0, %v3262_v3 }
 0x2f5   :  { %v2877_v27 = vpop.f32.mrb[65].mxu1 }
 0x2f6   :  { %v3841_v32 = vpop.f32.mrb[66].mxu1 }
 0x2f7   :  { %v2878_v34 = vpop.f32.mrb[67].mxu1 }
 0x2fb   :  { %2908 = vmatmul.mubr.msk.bf16.gmra.mrb[92].mxu0 %vm94_vm1, %v937_v60 }
 0x2fc   :  { %v3847_v59 = vpop.f32.mrb[68].mxu1  ;;  %2911 = vmatprep.mubr.msk.bf16.mxu0 %vm3263_vm0, %v3262_v3 }
 0x2fd   :  { %v2881_v40 = vpop.f32.mrb[69].mxu1 }
 0x2fe   :  { %v3851_v45 = vpop.f32.mrb[70].mxu1 }
 0x2ff   :  { %v2882_v47 = vpop.f32.mrb[71].mxu1 }
 0x303   :  { %2912 = vmatmul.mubr.msk.bf16.gmra.mrb[96].mxu0 %vm94_vm1, %v938_v11 }
 0x304   :  { %v3857_v62 = vpop.f32.mrb[72].mxu1  ;;  %2915 = vmatprep.mubr.msk.bf16.mxu0 %vm3263_vm0, %v3262_v3 }
 0x305   :  { %v2885_v53 = vpop.f32.mrb[73].mxu1 }
 0x306   :  { %v3861_v58 = vpop.f32.mrb[74].mxu1 }
 0x307   :  { %v2886_v60 = vpop.f32.mrb[75].mxu1 }
 0x30b   :  { %2916 = vmatmul.mubr.msk.bf16.gmra.mrb[100].mxu0 %vm94_vm1, %v939_v24 }
 0x30c   :  { %v3867_v4 = vpop.f32.mrb[76].mxu1  ;;  %2919 = vmatprep.mubr.msk.bf16.mxu0 %vm3263_vm0, %v3262_v3 }
 0x30d   :  { %v2889_v2 = vpop.f32.mrb[77].mxu1 }
 0x30e   :  { %v3871_v9 = vpop.f32.mrb[78].mxu1 }
 0x30f   :  { %v2890_v11 = vpop.f32.mrb[79].mxu1 }
 0x313   :  { %2920 = vmatmul.mubr.msk.bf16.gmra.mrb[104].mxu0 %vm94_vm1, %v940_v56  ;;  %v1414_v56 = vsel %vm1412_vm6, %v1354_v51, 0 }
 0x314   :  { %v3877_v10 = vpop.f32.mrb[80].mxu1  ;;  %2923 = vmatprep.mubr.msk.bf16.mxu0 %vm3263_vm0, %v3262_v3  ;;  %2958 = vmatpush3.bf16.msra.mxu0 %v1414_v56 }
 0x315   :  { %v2893_v17 = vpop.f32.mrb[81].mxu1  ;;  %3019 = vmatprep.subr.bf16.mxu0 %v3262_v3 }
 0x316   :  { %v3881_v22 = vpop.f32.mrb[82].mxu1 }
 0x317   :  { %v2894_v24 = vpop.f32.mrb[83].mxu1 }
 0x31b   :  { %2924 = vmatmul.mubr.msk.bf16.gmra.mrb[108].mxu0 %vm94_vm1, %v941_v31 }
 0x31c   :  { %2959 = vmatprep.mubr.msk.bf16.mxu0 %vm3263_vm0, %v3262_v3 }
 0x386   :  { %v3897_v8 = vpop.f32.mrb[56].mxu0 }
 0x387   :  { %v837_v21 = vmul.f32 %v3897_v8, %v3897_v8  ;;  %v2837_v31 = vpop.f32.mrb[57].mxu0 }
 0x388   :  { %v3901_v13 = vpop.f32.mrb[58].mxu0 }
 0x389   :  { %v838_v18 = vmul.f32 %v3901_v13, %v3901_v13  ;;  %v2838_v23 = vpop.f32.mrb[59].mxu0  ;;  %v851_v26 = vsel %vm148_vm2, %v837_v21, 0.0 }
 0x38a   :  { %852 = vadd.xlane.f32.xlu0 %v851_v26 }
 0x38b   :  { %v854_v39 = vsel %vm148_vm2, %v838_v18, 0.0 }
 0x38c   :  { %855 = vadd.xlane.f32.xlu1 %v854_v39  ;;  %v3162_v39 = vld [vmem:[%s4490_s6] sm:$0xff]  }
 0x38d   :  { %2960 = vmatmul.mubr.msk.bf16.vlgmr.msra.gmra.mrb[112].mxu0 %vm1390_vm7, %v3162_v39 }
 0x38e   :  { %v3907_v52 = vpop.f32.mrb[60].mxu0  ;;  %2963 = vmatprep.mubr.msk.bf16.mxu0 %vm3263_vm0, %v3262_v3 }
 0x38f   :  { %v839_v63 = vmul.f32 %v3907_v52, %v3907_v52  ;;  %v2841_v14 = vpop.f32.mrb[61].mxu0 }
 0x390   :  { %v3911_v30 = vpop.f32.mrb[62].mxu0 }
 0x391   :  { %v840_v44 = vmul.f32 %v3911_v30, %v3911_v30  ;;  %v2842_v7 = vpop.f32.mrb[63].mxu0  ;;  %v857_v16 = vsel %vm148_vm2, %v839_v63, 0.0 }
 0x392   :  { %858 = vadd.xlane.f32.xlu0 %v857_v16 }
 0x393   :  { %v860_v20 = vsel %vm148_vm2, %v840_v44, 0.0 }
 0x396   :  { %861 = vadd.xlane.f32.xlu0 %v860_v20  ;;  %v3917_v50 = vpop.f32.mrb[64].mxu0 }
 0x397   :  { %v841_v1 = vmul.f32 %v3917_v50, %v3917_v50  ;;  %v2845_v33 = vpop.f32.mrb[65].mxu0 }
 0x398   :  { %v3921_v41 = vpop.f32.mrb[66].mxu0 }
 0x399   :  { %v842_v49 = vmul.f32 %v3921_v41, %v3921_v41  ;;  %v2846_v27 = vpop.f32.mrb[67].mxu0  ;;  %v863_v34 = vsel %vm148_vm2, %v841_v1, 0.0 }
 0x39a   :  { %864 = vadd.xlane.f32.xlu1 %v863_v34 }
 0x39b   :  { %v866_v40 = vsel %vm148_vm2, %v842_v49, 0.0  ;;  %v3163_v49 = vld [vmem:[%s4490_s6 + $0x8] sm:$0xff]  }
 0x39c   :  { %867 = vadd.xlane.f32.xlu0 %v866_v40  ;;  %2964 = vmatmul.mubr.msk.bf16.gmra.mrb[116].mxu0 %vm1390_vm7, %v3163_v49  ;;  %v3166_v49 = vld [vmem:[%s4490_s6 + $0x20] sm:$0xff]  }
 0x39d   :  { %2967 = vmatprep.mubr.msk.bf16.mxu0 %vm3263_vm0, %v3262_v3 }
 0x39e   :  { %v3927_v47 = vpop.f32.mrb[68].mxu0 }
 0x39f   :  { %v843_v53 = vmul.f32 %v3927_v47, %v3927_v47  ;;  %v2849_v60 = vpop.f32.mrb[69].mxu0 }
 0x3a0   :  { %v3931_v2 = vpop.f32.mrb[70].mxu0 }
 0x3a1   :  { %v844_v11 = vmul.f32 %v3931_v2, %v3931_v2  ;;  %v2850_v17 = vpop.f32.mrb[71].mxu0  ;;  %v869_v24 = vsel %vm148_vm2, %v843_v53, 0.0 }
 0x3a2   :  { %870 = vadd.xlane.f32.xlu1 %v869_v24 }
 0x3a3   :  { %v872_v38 = vsel %vm148_vm2, %v844_v11, 0.0 }
 0x3a4   :  { %873 = vadd.xlane.f32.xlu0 %v872_v38  ;;  %v3164_v38 = vld [vmem:[%s4490_s6 + $0x10] sm:$0xff]  }
 0x3a5   :  { %2968 = vmatmul.mubr.msk.bf16.gmra.mrb[120].mxu0 %vm1390_vm7, %v3164_v38 }
 0x3a6   :  { %v3937_v51 = vpop.f32.mrb[72].mxu0  ;;  %2971 = vmatprep.mubr.msk.bf16.mxu0 %vm3263_vm0, %v3262_v3 }
 0x3a7   :  { %v845_v56 = vmul.f32 %v3937_v51, %v3937_v51  ;;  %v2853_v21 = vpop.f32.mrb[73].mxu0 }
 0x3a8   :  { %v3941_v31 = vpop.f32.mrb[74].mxu0 }
 0x3a9   :  { %v846_v18 = vmul.f32 %v3941_v31, %v3941_v31  ;;  %v2854_v23 = vpop.f32.mrb[75].mxu0  ;;  %v875_v26 = vsel %vm148_vm2, %v845_v56, 0.0 }
 0x3aa   :  { %876 = vadd.xlane.f32.xlu1 %v875_v26 }
 0x3ab   :  { %v878_v63 = vsel %vm148_vm2, %v846_v18, 0.0 }
 0x3ac   :  { %879 = vadd.xlane.f32.xlu0 %v878_v63 }
 0x3ae   :  { %v3953_v14 = vpop.f32.mrb[76].mxu0 }
 0x3af   :  { %v847_v44 = vmul.f32 %v3953_v14, %v3953_v14  ;;  %v2857_v7 = vpop.f32.mrb[77].mxu0 }
 0x3b0   :  { %v3957_v16 = vpop.f32.mrb[78].mxu0 }
 0x3b1   :  { %v848_v20 = vmul.f32 %v3957_v16, %v3957_v16  ;;  %v2858_v1 = vpop.f32.mrb[79].mxu0  ;;  %v881_v33 = vsel %vm148_vm2, %v847_v44, 0.0  ;;  %v3165_v44 = vld [vmem:[%s4490_s6 + $0x18] sm:$0xff]  }
 0x3b2   :  { %882 = vadd.xlane.f32.xlu1 %v881_v33  ;;  %2972 = vmatmul.mubr.msk.bf16.gmra.mrb[124].mxu0 %vm1390_vm7, %v3165_v44 }
 0x3b3   :  { %v884_v27 = vsel %vm148_vm2, %v848_v20, 0.0  ;;  %2975 = vmatprep.mubr.msk.bf16.mxu0 %vm3263_vm0, %v3262_v3 }
 0x3b4   :  { %885 = vadd.xlane.f32.xlu0 %v884_v27 }
 0x3b6   :  { %v3969_v34 = vpop.f32.mrb[80].mxu0 }
 0x3b7   :  { %v849_v40 = vmul.f32 %v3969_v34, %v3969_v34  ;;  %v2861_v53 = vpop.f32.mrb[81].mxu0 }
 0x3b8   :  { %v3973_v60 = vpop.f32.mrb[82].mxu0 }
 0x3b9   :  { %v850_v11 = vmul.f32 %v3973_v60, %v3973_v60  ;;  %v2862_v17 = vpop.f32.mrb[83].mxu0  ;;  %v887_v24 = vsel %vm148_vm2, %v849_v40, 0.0 }
 0x3ba   :  { %888 = vadd.xlane.f32.xlu1 %v887_v24  ;;  %2976 = vmatmul.mubr.msk.bf16.gmra.mrb[128].mxu0 %vm1390_vm7, %v3166_v49  ;;  %v3167_v17 = vld [vmem:[%s4490_s6 + $0x28] sm:$0xff]  }
 0x3bb   :  { %v890_v56 = vsel %vm148_vm2, %v850_v11, 0.0  ;;  %2979 = vmatprep.mubr.msk.bf16.mxu0 %vm3263_vm0, %v3262_v3 }
 0x3bc   :  { %891 = vadd.xlane.f32.xlu0 %v890_v56 }
 0x3be   :  { %v1146_v21 = vpop.f32.mrb[84].mxu0 }
 0x3bf   :  { %v3986_v18 = vadd.f32 %v1146_v21, %v3817_v0  ;;  %v2901_v23 = vpop.f32.mrb[85].mxu0 }
 0x3c0   :  { %v1149_v26 = vpop.f32.mrb[86].mxu0  ;;  %v3168_v23 = vld [vmem:[%s4490_s6 + $0x30] sm:$0xff]  }
 0x3c1   :  { %v3989_v39 = vadd.f32 %v1149_v26, %v3821_v28  ;;  %v2902_v63 = vpop.f32.mrb[87].mxu0 }
 0x3c2   :  { %2980 = vmatmul.mubr.msk.bf16.gmra.mrb[132].mxu0 %vm1390_vm7, %v3167_v17 }
 0x3c3   :  { %2983 = vmatprep.mubr.msk.bf16.mxu0 %vm3263_vm0, %v3262_v3 }
 0x3c6   :  { %v1154_v7 = vpop.f32.mrb[88].mxu0 }
 0x3c7   :  { %v3998_v20 = vadd.f32 %v1154_v7, %v3827_v36  ;;  %v2905_v0 = vpop.f32.mrb[89].mxu0 }
 0x3c8   :  { %v1157_v1 = vpop.f32.mrb[90].mxu0 }
 0x3c9   :  { %v4001_v33 = vadd.f32 %v1157_v1, %v3831_v46  ;;  %v2906_v28 = vpop.f32.mrb[91].mxu0 }
 0x3ca   :  { %2984 = vmatmul.mubr.msk.bf16.gmra.mrb[136].mxu0 %vm1390_vm7, %v3168_v23 }
 0x3cb   :  { %3023 = vmatprep.mubr.msk.bf16.mxu0 %vm3263_vm0, %v3262_v3 }
 0x3ce   :  { %v1162_v27 = vpop.f32.mrb[92].mxu0 }
 0x3cf   :  { %v4010_v40 = vadd.f32 %v1162_v27, %v3837_v54  ;;  %v2909_v36 = vpop.f32.mrb[93].mxu0 }
 0x3d0   :  { %v1165_v53 = vpop.f32.mrb[94].mxu0 }
 0x3d1   :  { %v4013_v11 = vadd.f32 %v1165_v53, %v3841_v32  ;;  %v2910_v46 = vpop.f32.mrb[95].mxu0 }
 0x3d6   :  { %v1170_v24 = vpop.f32.mrb[96].mxu0 }
 0x3d7   :  { %v4022_v38 = vadd.f32 %v1170_v24, %v3847_v59  ;;  %v2913_v54 = vpop.f32.mrb[97].mxu0 }
 0x3d8   :  { %v1173_v56 = vpop.f32.mrb[98].mxu0 }
 0x3d9   :  { %v4025_v21 = vadd.f32 %v1173_v56, %v3851_v45  ;;  %v2914_v32 = vpop.f32.mrb[99].mxu0 }
 0x3de   :  { %v1178_v26 = vpop.f32.mrb[100].mxu0 }
 0x3df   :  { %v4034_v63 = vadd.f32 %v1178_v26, %v3857_v62  ;;  %v2917_v59 = vpop.f32.mrb[101].mxu0 }
 0x3e0   :  { %v1181_v44 = vpop.f32.mrb[102].mxu0 }
 0x3e1   :  { %v4037_v7 = vadd.f32 %v1181_v44, %v3861_v58  ;;  %v2918_v45 = vpop.f32.mrb[103].mxu0 }
 0x3e6   :  { %v1186_v0 = vpop.f32.mrb[104].mxu0 }
 0x3e7   :  { %v4040_v1 = vadd.f32 %v1186_v0, %v3867_v4  ;;  %v2921_v28 = vpop.f32.mrb[105].mxu0 }
 0x3e8   :  { %v1189_v49 = vpop.f32.mrb[106].mxu0 }
 0x3e9   :  { %v4043_v27 = vadd.f32 %v1189_v49, %v3871_v9  ;;  %v2922_v36 = vpop.f32.mrb[107].mxu0  ;;  %v3169_v49 = vld [vmem:[%s4451_s15] sm:$0xff]  }
 0x3ee   :  { %v1194_v53 = vpop.f32.mrb[108].mxu0 }
 0x3ef   :  { %v4046_v62 = vadd.f32 %v1194_v53, %v3877_v10  ;;  %v2925_v46 = vpop.f32.mrb[109].mxu0 }
 0x3f0   :  { %v1197_v17 = vpop.f32.mrb[110].mxu0 }
 0x3f1   :  { %v4049_v58 = vadd.f32 %v1197_v17, %v3881_v22  ;;  %v2926_v24 = vpop.f32.mrb[111].mxu0 }
 0x417   :  { %v853_v54 = vpop.xlane.xlu0 %852 }
 0x418   :  { %v893_v56 = vmax.f32 %v853_v54, 1e-24 }
 0x419   :  { %v856_v4 = vpop.xlane.xlu1 %855 }
 0x41a   :  { %3182 = vrsqrt.f32 %v893_v56  ;;  %v894_v32 = vmax.f32 %v856_v4, 1e-24 }
 0x41c   :  { %3184 = vrsqrt.f32 %v894_v32 }
 0x41f   :  { %v859_v23 = vpop.xlane.xlu0 %858 }
 0x420   :  { %v895_v9 = vmax.f32 %v859_v23, 1e-24 }
 0x422   :  { %3186 = vrsqrt.f32 %v895_v9 }
 0x423   :  { %v862_v26 = vpop.xlane.xlu0 %861 }
 0x424   :  { %v3183_v59 = vpop.eup %3182  ;;  %v896_v44 = vmax.f32 %v862_v26, 1e-24 }
 0x425   :  { %v921_v45 = vmul.f32 %v3183_v59, %v3897_v8  ;;  %v3170_v8 = vld [vmem:[%s4451_s15 + $0x8] sm:$0xff]  }
 0x426   :  { %v3185_v10 = vpop.eup %3184  ;;  %3188 = vrsqrt.f32 %v896_v44 }
 0x427   :  { %v922_v22 = vmul.f32 %v3185_v10, %v3901_v13  ;;  %v865_v0 = vpop.xlane.xlu1 %864 }
 0x428   :  { %v897_v28 = vmax.f32 %v865_v0, 1e-24 }
 0x429   :  { %v1201_v36 = vpack.c.bf16 %v922_v22, %v921_v45  ;;  %v868_v53 = vpop.xlane.xlu0 %867 }
 0x42a   :  { %3190 = vrsqrt.f32 %v897_v28  ;;  %v898_v46 = vmax.f32 %v868_v53, 1e-24 }
 0x42b   :  { %2930 = vmatmul.mubr.msk.bf16.vlgmr.msra.gmra.mrb[84].mxu1 %vm148_vm2, %v1201_v36 }
 0x42c   :  { %3192 = vrsqrt.f32 %v898_v46  ;;  %2933 = vmatprep.mubr.msk.bf16.mxu1 %vm3263_vm0, %v3262_v3  ;;  %2988 = vmatpush3.bf16.msra.mxu1 %v3169_v49  ;;  %v3187_v13 = vpop.eup %3186 }
 0x42d   :  { %2989 = vmatprep.subr.bf16.mxu1 %v3262_v3  ;;  %v923_v4 = vmul.f32 %v3187_v13, %v3907_v52 }
 0x42f   :  { %v871_v17 = vpop.xlane.xlu1 %870 }
 0x430   :  { %v3189_v24 = vpop.eup %3188  ;;  %v899_v54 = vmax.f32 %v871_v17, 1e-24  ;;  %2990 = vmatpush3.bf16.msra.mxu1 %v3170_v8 }
 0x431   :  { %v874_v56 = vpop.xlane.xlu0 %873  ;;  %v924_v32 = vmul.f32 %v3189_v24, %v3911_v30  ;;  %3051 = vmatprep.subr.bf16.mxu1 %v3262_v3 }
 0x432   :  { %3194 = vrsqrt.f32 %v899_v54  ;;  %v900_v23 = vmax.f32 %v874_v56, 1e-24 }
 0x433   :  { %v1202_v9 = vpack.c.bf16 %v924_v32, %v923_v4 }
 0x434   :  { %v3191_v26 = vpop.eup %3190  ;;  %3196 = vrsqrt.f32 %v900_v23 }
 0x435   :  { %2934 = vmatmul.mubr.msk.bf16.gmra.mrb[88].mxu1 %vm148_vm2, %v1202_v9  ;;  %v925_v10 = vmul.f32 %v3191_v26, %v3917_v50 }
 0x436   :  { %v3193_v59 = vpop.eup %3192  ;;  %2937 = vmatprep.mubr.msk.bf16.mxu1 %vm3263_vm0, %v3262_v3 }
 0x437   :  { %v877_v44 = vpop.xlane.xlu1 %876  ;;  %v926_v52 = vmul.f32 %v3193_v59, %v3921_v41 }
 0x438   :  { %v901_v45 = vmax.f32 %v877_v44, 1e-24 }
 0x439   :  { %v880_v30 = vpop.xlane.xlu0 %879  ;;  %v1203_v22 = vpack.c.bf16 %v926_v52, %v925_v10 }
 0x43a   :  { %3198 = vrsqrt.f32 %v901_v45  ;;  %v902_v0 = vmax.f32 %v880_v30, 1e-24 }
 0x43c   :  { %v3195_v28 = vpop.eup %3194  ;;  %3200 = vrsqrt.f32 %v902_v0 }
 0x43d   :  { %2938 = vmatmul.mubr.msk.bf16.gmra.mrb[92].mxu1 %vm148_vm2, %v1203_v22  ;;  %v927_v53 = vmul.f32 %v3195_v28, %v3927_v47 }
 0x43e   :  { %v3197_v49 = vpop.eup %3196  ;;  %2941 = vmatprep.mubr.msk.bf16.mxu1 %vm3263_vm0, %v3262_v3 }
 0x43f   :  { %v883_v36 = vpop.xlane.xlu1 %882  ;;  %v928_v50 = vmul.f32 %v3197_v49, %v3931_v2 }
 0x440   :  { %v903_v46 = vmax.f32 %v883_v36, 1e-24 }
 0x441   :  { %v886_v41 = vpop.xlane.xlu0 %885  ;;  %v1204_v8 = vpack.c.bf16 %v928_v50, %v927_v53 }
 0x442   :  { %3202 = vrsqrt.f32 %v903_v46  ;;  %v904_v13 = vmax.f32 %v886_v41, 1e-24 }
 0x444   :  { %v3199_v17 = vpop.eup %3198  ;;  %3204 = vrsqrt.f32 %v904_v13 }
 0x445   :  { %2942 = vmatmul.mubr.msk.bf16.gmra.mrb[96].mxu1 %vm148_vm2, %v1204_v8  ;;  %v929_v56 = vmul.f32 %v3199_v17, %v3937_v51 }
 0x446   :  { %v3201_v24 = vpop.eup %3200  ;;  %2945 = vmatprep.mubr.msk.bf16.mxu1 %vm3263_vm0, %v3262_v3 }
 0x447   :  { %v889_v54 = vpop.xlane.xlu1 %888  ;;  %v930_v47 = vmul.f32 %v3201_v24, %v3941_v31 }
 0x448   :  { %v905_v4 = vmax.f32 %v889_v54, 1e-24 }
 0x449   :  { %v892_v2 = vpop.xlane.xlu0 %891  ;;  %v1205_v32 = vpack.c.bf16 %v930_v47, %v929_v56 }
 0x44a   :  { %3206 = vrsqrt.f32 %v905_v4  ;;  %v906_v23 = vmax.f32 %v892_v2, 1e-24 }
 0x44c   :  { %v3203_v9 = vpop.eup %3202  ;;  %3208 = vrsqrt.f32 %v906_v23 }
 0x44d   :  { %2946 = vmatmul.mubr.msk.bf16.gmra.mrb[100].mxu1 %vm148_vm2, %v1205_v32  ;;  %v931_v59 = vmul.f32 %v3203_v9, %v3953_v14 }
 0x44e   :  { %v3205_v26 = vpop.eup %3204  ;;  %2949 = vmatprep.mubr.msk.bf16.mxu1 %vm3263_vm0, %v3262_v3 }
 0x44f   :  { %v932_v44 = vmul.f32 %v3205_v26, %v3957_v16 }
 0x451   :  { %v1206_v51 = vpack.c.bf16 %v932_v44, %v931_v59 }
 0x454   :  { %v3207_v10 = vpop.eup %3206 }
 0x455   :  { %2950 = vmatmul.mubr.msk.bf16.gmra.mrb[104].mxu1 %vm148_vm2, %v1206_v51  ;;  %v933_v52 = vmul.f32 %v3207_v10, %v3969_v34  ;;  %v3171_v51 = vld [vmem:[%s4453_s17] sm:$0xff]   ;;  %v3172_v10 = vld [vmem:[%s4453_s17 + $0x8] sm:$0xff]  }
 0x456   :  { %v3209_v31 = vpop.eup %3208  ;;  %2953 = vmatprep.mubr.msk.bf16.mxu1 %vm3263_vm0, %v3262_v3  ;;  %3020 = vmatpush3.bf16.msra.mxu0 %v3171_v51 }
 0x457   :  { %v934_v45 = vmul.f32 %v3209_v31, %v3973_v60  ;;  %3021 = vmatprep.subr.bf16.mxu0 %v3262_v3 }
 0x459   :  { %v1207_v30 = vpack.c.bf16 %v934_v45, %v933_v52 }
 0x45a   :  { %3022 = vmatpush3.bf16.msra.mxu0 %v3172_v10 }
 0x45b   :  { %3083 = vmatprep.subr.bf16.mxu0 %v3262_v3 }
 0x45d   :  { %2954 = vmatmul.mubr.msk.bf16.gmra.mrb[108].mxu1 %vm148_vm2, %v1207_v30  ;;  %v4122_v30 = vld [vmem:[%s4450_s14] ss:$0 sm:$0xff] }
 0x45e   :  { %2991 = vmatprep.mubr.msk.bf16.mxu1 %vm3263_vm0, %v3262_v3 }
 0x460   :  { %v1450_v14 = vpop.f32.mrb[112].mxu0 }
 0x461   :  { %v2961_v16 = vpop.f32.mrb[113].mxu0 }
 0x462   :  { %v1453_v22 = vpop.f32.mrb[114].mxu0 }
 0x463   :  { %v2962_v0 = vpop.f32.mrb[115].mxu0 }
 0x46f   :  { %v1458_v28 = vpop.f32.mrb[116].mxu0 }
 0x470   :  { %v2965_v49 = vpop.f32.mrb[117].mxu0 }
 0x471   :  { %v1461_v36 = vpop.f32.mrb[118].mxu0 }
 0x472   :  { %v2966_v53 = vpop.f32.mrb[119].mxu0 }
 0x478   :  { %v1466_v50 = vpop.f32.mrb[120].mxu0 }
 0x479   :  { %v2969_v46 = vpop.f32.mrb[121].mxu0 }
 0x47a   :  { %v1469_v41 = vpop.f32.mrb[122].mxu0 }
 0x47b   :  { %v2970_v34 = vpop.f32.mrb[123].mxu0 }
 0x485   :  { %v4094_v8 = vpop.f32.mrb[124].mxu0 }
 0x486   :  { %v2973_v60 = vpop.f32.mrb[125].mxu0 }
 0x487   :  { %v4096_v13 = vpop.f32.mrb[126].mxu0 }
 0x488   :  { %v2974_v17 = vpop.f32.mrb[127].mxu0 }
 0x48d   :  { %v4098_v24 = vpop.f32.mrb[128].mxu0 }
 0x48e   :  { %v2977_v54 = vpop.f32.mrb[129].mxu0 }
 0x48f   :  { %v4100_v56 = vpop.f32.mrb[130].mxu0 }
 0x490   :  { %v2978_v47 = vpop.f32.mrb[131].mxu0 }
 0x495   :  { %v4102_v4 = vpop.f32.mrb[132].mxu0 }
 0x496   :  { %v2981_v2 = vpop.f32.mrb[133].mxu0 }
 0x497   :  { %v4104_v32 = vpop.f32.mrb[134].mxu0 }
 0x498   :  { %v2982_v23 = vpop.f32.mrb[135].mxu0 }
 0x49d   :  { %v4106_v9 = vpop.f32.mrb[136].mxu0 }
 0x49e   :  { %v2985_v26 = vpop.f32.mrb[137].mxu0 }
 0x49f   :  { %v4108_v59 = vpop.f32.mrb[138].mxu0 }
 0x4a0   :  { %v2986_v44 = vpop.f32.mrb[139].mxu0 }
 0x4fe   :  { %v1271_v31 = vpop.f32.mrb[84].mxu1 }
 0x4ff   :  { %v1326_v52 = vadd.f32 %v1271_v31, %v3986_v18  ;;  %v2931_v45 = vpop.f32.mrb[85].mxu1 }
 0x500   :  { %v1274_v16 = vpop.f32.mrb[86].mxu1 }
 0x501   :  { %v1505_v0 = vadd.f32 %v1450_v14, %v1326_v52  ;;  %v1327_v49 = vadd.f32 %v1274_v16, %v3989_v39  ;;  %v2932_v53 = vpop.f32.mrb[87].mxu1 }
 0x503   :  { %v1526_v46 = vadd.f32 %v4122_v30, %v1505_v0  ;;  %v1506_v34 = vadd.f32 %v1453_v22, %v1327_v49 }
 0x505   :  { %v1527_v60 = vadd.f32 %v4122_v30, %v1506_v34  ;;  %v1540_v17 = vmax.f32 %v1526_v46, 0.0 }
 0x507   :  { %v1541_v54 = vmax.f32 %v1527_v60, 0.0 }
 0x508   :  { %v1279_v47 = vpop.f32.mrb[88].mxu1 }
 0x509   :  { %v1554_v18 = vpack.c.bf16 %v1541_v54, %v1540_v17  ;;  %v1328_v2 = vadd.f32 %v1279_v47, %v3998_v20  ;;  %v2935_v23 = vpop.f32.mrb[89].mxu1 }
 0x50a   :  { %v1282_v26 = vpop.f32.mrb[90].mxu1 }
 0x50b   :  { %v1507_v44 = vadd.f32 %v1458_v28, %v1328_v2  ;;  %v1329_v51 = vadd.f32 %v1282_v26, %v4001_v33  ;;  %v2936_v14 = vpop.f32.mrb[91].mxu1  ;;  %2992 = vmatmul.mubr.msk.bf16.vlgmr.msra.gmra.mrb[112].mxu1 %vm94_vm1, %v1554_v18 }
 0x50c   :  { %2995 = vmatprep.mubr.msk.bf16.mxu1 %vm3263_vm0, %v3262_v3 }
 0x50d   :  { %v1528_v39 = vadd.f32 %v4122_v30, %v1507_v44  ;;  %v1508_v22 = vadd.f32 %v1461_v36, %v1329_v51 }
 0x50f   :  { %v1529_v10 = vadd.f32 %v4122_v30, %v1508_v22  ;;  %v1542_v52 = vmax.f32 %v1528_v39, 0.0 }
 0x510   :  { %v1287_v31 = vpop.f32.mrb[92].mxu1 }
 0x511   :  { %v1543_v45 = vmax.f32 %v1529_v10, 0.0  ;;  %v1330_v20 = vadd.f32 %v1287_v31, %v4010_v40  ;;  %v2939_v16 = vpop.f32.mrb[93].mxu1 }
 0x512   :  { %v1290_v28 = vpop.f32.mrb[94].mxu1 }
 0x513   :  { %v1555_v0 = vpack.c.bf16 %v1543_v45, %v1542_v52  ;;  %v1509_v33 = vadd.f32 %v1466_v50, %v1330_v20  ;;  %v1331_v49 = vadd.f32 %v1290_v28, %v4013_v11  ;;  %v2940_v53 = vpop.f32.mrb[95].mxu1 }
 0x515   :  { %v1530_v46 = vadd.f32 %v4122_v30, %v1509_v33  ;;  %v1510_v34 = vadd.f32 %v1469_v41, %v1331_v49  ;;  %2996 = vmatmul.mubr.msk.bf16.gmra.mrb[116].mxu1 %vm94_vm1, %v1555_v0 }
 0x516   :  { %2999 = vmatprep.mubr.msk.bf16.mxu1 %vm3263_vm0, %v3262_v3 }
 0x517   :  { %v1531_v36 = vadd.f32 %v4122_v30, %v1510_v34  ;;  %v1544_v17 = vmax.f32 %v1530_v46, 0.0 }
 0x518   :  { %v1295_v60 = vpop.f32.mrb[96].mxu1 }
 0x519   :  { %v1545_v40 = vmax.f32 %v1531_v36, 0.0  ;;  %v1332_v54 = vadd.f32 %v1295_v60, %v4022_v38  ;;  %v2943_v47 = vpop.f32.mrb[97].mxu1 }
 0x51a   :  { %v1298_v50 = vpop.f32.mrb[98].mxu1 }
 0x51b   :  { %v1556_v18 = vpack.c.bf16 %v1545_v40, %v1544_v17  ;;  %v1511_v11 = vadd.f32 %v4094_v8, %v1332_v54  ;;  %v1333_v2 = vadd.f32 %v1298_v50, %v4025_v21  ;;  %v2944_v41 = vpop.f32.mrb[99].mxu1 }
 0x51d   :  { %v1532_v23 = vadd.f32 %v4122_v30, %v1511_v11  ;;  %v1512_v26 = vadd.f32 %v4096_v13, %v1333_v2  ;;  %3000 = vmatmul.mubr.msk.bf16.gmra.mrb[120].mxu1 %vm94_vm1, %v1556_v18 }
 0x51e   :  { %3003 = vmatprep.mubr.msk.bf16.mxu1 %vm3263_vm0, %v3262_v3 }
 0x51f   :  { %v1533_v44 = vadd.f32 %v4122_v30, %v1512_v26  ;;  %v1546_v51 = vmax.f32 %v1532_v23, 0.0 }
 0x520   :  { %v1303_v38 = vpop.f32.mrb[100].mxu1 }
 0x521   :  { %v1547_v14 = vmax.f32 %v1533_v44, 0.0  ;;  %v1334_v39 = vadd.f32 %v1303_v38, %v4034_v63  ;;  %v2947_v8 = vpop.f32.mrb[101].mxu1 }
 0x522   :  { %v1306_v22 = vpop.f32.mrb[102].mxu1 }
 0x523   :  { %v1557_v21 = vpack.c.bf16 %v1547_v14, %v1546_v51  ;;  %v1513_v10 = vadd.f32 %v4098_v24, %v1334_v39  ;;  %v1335_v31 = vadd.f32 %v1306_v22, %v4037_v7  ;;  %v2948_v13 = vpop.f32.mrb[103].mxu1 }
 0x525   :  { %v1534_v52 = vadd.f32 %v4122_v30, %v1513_v10  ;;  %v1514_v45 = vadd.f32 %v4100_v56, %v1335_v31  ;;  %3004 = vmatmul.mubr.msk.bf16.gmra.mrb[124].mxu1 %vm94_vm1, %v1557_v21 }
 0x526   :  { %3007 = vmatprep.mubr.msk.bf16.mxu1 %vm3263_vm0, %v3262_v3 }
 0x527   :  { %v1535_v20 = vadd.f32 %v4122_v30, %v1514_v45  ;;  %v1548_v16 = vmax.f32 %v1534_v52, 0.0 }
 0x528   :  { %v1311_v63 = vpop.f32.mrb[104].mxu1 }
 0x529   :  { %v1549_v28 = vmax.f32 %v1535_v20, 0.0  ;;  %v1336_v0 = vadd.f32 %v1311_v63, %v4040_v1  ;;  %v2951_v24 = vpop.f32.mrb[105].mxu1 }
 0x52a   :  { %v1314_v33 = vpop.f32.mrb[106].mxu1 }
 0x52b   :  { %v1558_v7 = vpack.c.bf16 %v1549_v28, %v1548_v16  ;;  %v1515_v49 = vadd.f32 %v4102_v4, %v1336_v0  ;;  %v1337_v53 = vadd.f32 %v1314_v33, %v4043_v27  ;;  %v2952_v56 = vpop.f32.mrb[107].mxu1 }
 0x52d   :  { %v1536_v46 = vadd.f32 %v4122_v30, %v1515_v49  ;;  %v1516_v34 = vadd.f32 %v4104_v32, %v1337_v53  ;;  %3008 = vmatmul.mubr.msk.bf16.gmra.mrb[128].mxu1 %vm94_vm1, %v1558_v7 }
 0x52e   :  { %3011 = vmatprep.mubr.msk.bf16.mxu1 %vm3263_vm0, %v3262_v3 }
 0x52f   :  { %v1537_v36 = vadd.f32 %v4122_v30, %v1516_v34  ;;  %v1550_v60 = vmax.f32 %v1536_v46, 0.0 }
 0x530   :  { %v1319_v1 = vpop.f32.mrb[108].mxu1 }
 0x531   :  { %v1551_v17 = vmax.f32 %v1537_v36, 0.0  ;;  %v1338_v40 = vadd.f32 %v1319_v1, %v4046_v62  ;;  %v2955_v4 = vpop.f32.mrb[109].mxu1 }
 0x532   :  { %v1322_v54 = vpop.f32.mrb[110].mxu1 }
 0x533   :  { %v1559_v27 = vpack.c.bf16 %v1551_v17, %v1550_v60  ;;  %v1517_v47 = vadd.f32 %v4106_v9, %v1338_v40  ;;  %v1339_v50 = vadd.f32 %v1322_v54, %v4049_v58  ;;  %v2956_v32 = vpop.f32.mrb[111].mxu1  ;;  %v3173_v58 = vld [vmem:[%s4455_s19] sm:$0xff]   ;;  %v3174_v9 = vld [vmem:[%s4455_s19 + $0x8] sm:$0xff]  }
 0x534   :  { %3052 = vmatpush3.bf16.msra.mxu1 %v3173_v58 }
 0x535   :  { %v1538_v18 = vadd.f32 %v4122_v30, %v1517_v47  ;;  %v1518_v11 = vadd.f32 %v4108_v59, %v1339_v50  ;;  %3012 = vmatmul.mubr.msk.bf16.gmra.mrb[132].mxu1 %vm94_vm1, %v1559_v27  ;;  %3053 = vmatprep.subr.bf16.mxu1 %v3262_v3  ;;  %v4191_v59 = vld [vmem:[%s4452_s16] ss:$0 sm:$0xff] }
 0x536   :  { %3015 = vmatprep.mubr.msk.bf16.mxu1 %vm3263_vm0, %v3262_v3 }
 0x537   :  { %v1539_v2 = vadd.f32 %v4122_v30, %v1518_v11  ;;  %v1552_v62 = vmax.f32 %v1538_v18, 0.0 }
 0x538   :  { %3054 = vmatpush3.bf16.msra.mxu1 %v3174_v9 }
 0x539   :  { %v1553_v41 = vmax.f32 %v1539_v2, 0.0  ;;  %3101 = vmatprep.subr.bf16.mxu1 %v3262_v3 }
 0x53b   :  { %v1560_v23 = vpack.c.bf16 %v1553_v41, %v1552_v62 }
 0x53d   :  { %3016 = vmatmul.mubr.msk.bf16.gmra.mrb[136].mxu1 %vm94_vm1, %v1560_v23 }
 0x53e   :  { %3055 = vmatprep.mubr.msk.bf16.mxu1 %vm3263_vm0, %v3262_v3 }
 0x5de   :  { %v1639_v30 = vpop.f32.mrb[112].mxu1 }
 0x5df   :  { %v1640_v26 = vadd.f32 %v4191_v59, %v1639_v30  ;;  %v2993_v44 = vpop.f32.mrb[113].mxu1 }
 0x5e0   :  { %v1642_v38 = vpop.f32.mrb[114].mxu1 }
 0x5e1   :  { %v1643_v51 = vadd.f32 %v4191_v59, %v1642_v38  ;;  %v2994_v14 = vpop.f32.mrb[115].mxu1  ;;  %v1694_v39 = vmax.f32 %v1640_v26, 0.0 }
 0x5e3   :  { %v1695_v8 = vmax.f32 %v1643_v51, 0.0 }
 0x5e5   :  { %v4195_v22 = vpack.c.bf16 %v1695_v8, %v1694_v39 }
 0x5e7   :  { %3024 = vmatmul.mubr.msk.bf16.vlgmr.msra.gmra.mrb[140].mxu0 %vm94_vm1, %v4195_v22 }
 0x5e8   :  { %v1647_v21 = vpop.f32.mrb[116].mxu1  ;;  %3027 = vmatprep.mubr.msk.bf16.mxu0 %vm3263_vm0, %v3262_v3 }
 0x5e9   :  { %v1648_v10 = vadd.f32 %v4191_v59, %v1647_v21  ;;  %v2997_v31 = vpop.f32.mrb[117].mxu1 }
 0x5ea   :  { %v1650_v13 = vpop.f32.mrb[118].mxu1 }
 0x5eb   :  { %v1651_v52 = vadd.f32 %v4191_v59, %v1650_v13  ;;  %v2998_v45 = vpop.f32.mrb[119].mxu1  ;;  %v1696_v20 = vmax.f32 %v1648_v10, 0.0 }
 0x5ed   :  { %v1697_v63 = vmax.f32 %v1651_v52, 0.0 }
 0x5ef   :  { %v4203_v16 = vpack.c.bf16 %v1697_v63, %v1696_v20 }
 0x5f0   :  { %v1655_v28 = vpop.f32.mrb[120].mxu1 }
 0x5f1   :  { %v1656_v0 = vadd.f32 %v4191_v59, %v1655_v28  ;;  %v3001_v24 = vpop.f32.mrb[121].mxu1  ;;  %3028 = vmatmul.mubr.msk.bf16.gmra.mrb[144].mxu0 %vm94_vm1, %v4203_v16  ;;  %v4252_v28 = vld [vmem:[%s4454_s18] ss:$0 sm:$0xff]  ;;  %s3266_s18 = smov 12  }
 0x5f2   :  { %v1658_v33 = vpop.f32.mrb[122].mxu1  ;;  %3031 = vmatprep.mubr.msk.bf16.mxu0 %vm3263_vm0, %v3262_v3 }
 0x5f3   :  { %v1659_v7 = vadd.f32 %v4191_v59, %v1658_v33  ;;  %v3002_v49 = vpop.f32.mrb[123].mxu1  ;;  %v1698_v53 = vmax.f32 %v1656_v0, 0.0 }
 0x5f5   :  { %v1699_v56 = vmax.f32 %v1659_v7, 0.0 }
 0x5f7   :  { %v4211_v46 = vpack.c.bf16 %v1699_v56, %v1698_v53 }
 0x5f8   :  { %v1663_v34 = vpop.f32.mrb[124].mxu1 }
 0x5f9   :  { %v1664_v36 = vadd.f32 %v4191_v59, %v1663_v34  ;;  %v3005_v1 = vpop.f32.mrb[125].mxu1  ;;  %3032 = vmatmul.mubr.msk.bf16.gmra.mrb[148].mxu0 %vm94_vm1, %v4211_v46 }
 0x5fa   :  { %v1666_v60 = vpop.f32.mrb[126].mxu1  ;;  %3035 = vmatprep.mubr.msk.bf16.mxu0 %vm3263_vm0, %v3262_v3 }
 0x5fb   :  { %v1667_v17 = vadd.f32 %v4191_v59, %v1666_v60  ;;  %v3006_v40 = vpop.f32.mrb[127].mxu1  ;;  %v1700_v4 = vmax.f32 %v1664_v36, 0.0 }
 0x5fd   :  { %v1701_v54 = vmax.f32 %v1667_v17, 0.0 }
 0x5ff   :  { %v4219_v27 = vpack.c.bf16 %v1701_v54, %v1700_v4 }
 0x600   :  { %v1671_v47 = vpop.f32.mrb[128].mxu1 }
 0x601   :  { %v1672_v50 = vadd.f32 %v4191_v59, %v1671_v47  ;;  %v3009_v32 = vpop.f32.mrb[129].mxu1  ;;  %3036 = vmatmul.mubr.msk.bf16.gmra.mrb[152].mxu0 %vm94_vm1, %v4219_v27 }
 0x602   :  { %v1674_v18 = vpop.f32.mrb[130].mxu1  ;;  %3039 = vmatprep.mubr.msk.bf16.mxu0 %vm3263_vm0, %v3262_v3 }
 0x603   :  { %v1675_v11 = vadd.f32 %v4191_v59, %v1674_v18  ;;  %v3010_v2 = vpop.f32.mrb[131].mxu1  ;;  %v1702_v62 = vmax.f32 %v1672_v50, 0.0 }
 0x605   :  { %v1703_v41 = vmax.f32 %v1675_v11, 0.0 }
 0x607   :  { %v4227_v23 = vpack.c.bf16 %v1703_v41, %v1702_v62 }
 0x608   :  { %v1679_v58 = vpop.f32.mrb[132].mxu1 }
 0x609   :  { %v1680_v9 = vadd.f32 %v4191_v59, %v1679_v58  ;;  %v3013_v30 = vpop.f32.mrb[133].mxu1  ;;  %3040 = vmatmul.mubr.msk.bf16.gmra.mrb[156].mxu0 %vm94_vm1, %v4227_v23 }
 0x60a   :  { %v1682_v26 = vpop.f32.mrb[134].mxu1  ;;  %3043 = vmatprep.mubr.msk.bf16.mxu0 %vm3263_vm0, %v3262_v3 }
 0x60b   :  { %v1683_v44 = vadd.f32 %v4191_v59, %v1682_v26  ;;  %v3014_v38 = vpop.f32.mrb[135].mxu1  ;;  %v1704_v51 = vmax.f32 %v1680_v9, 0.0 }
 0x60d   :  { %v1705_v14 = vmax.f32 %v1683_v44, 0.0 }
 0x60f   :  { %v4235_v39 = vpack.c.bf16 %v1705_v14, %v1704_v51 }
 0x610   :  { %v1687_v8 = vpop.f32.mrb[136].mxu1 }
 0x611   :  { %v1688_v21 = vadd.f32 %v4191_v59, %v1687_v8  ;;  %v3017_v10 = vpop.f32.mrb[137].mxu1  ;;  %3044 = vmatmul.mubr.msk.bf16.gmra.mrb[160].mxu0 %vm94_vm1, %v4235_v39 }
 0x612   :  { %v1690_v31 = vpop.f32.mrb[138].mxu1  ;;  %3047 = vmatprep.mubr.msk.bf16.mxu0 %vm3263_vm0, %v3262_v3 }
 0x613   :  { %v1691_v13 = vadd.f32 %v4191_v59, %v1690_v31  ;;  %v3018_v52 = vpop.f32.mrb[139].mxu1  ;;  %v1706_v45 = vmax.f32 %v1688_v21, 0.0 }
 0x615   :  { %v1707_v20 = vmax.f32 %v1691_v13, 0.0 }
 0x617   :  { %v4243_v63 = vpack.c.bf16 %v1707_v20, %v1706_v45 }
 0x619   :  { %3048 = vmatmul.mubr.msk.bf16.gmra.mrb[164].mxu0 %vm94_vm1, %v4243_v63 }
 0x61a   :  { %3097 = vmatprep.mubr.msk.bf16.mxu0 %vm3263_vm0, %v3262_v3 }
 0x6ba   :  { %v1793_v0 = vpop.f32.mrb[140].mxu0 }
 0x6bb   :  { %v1794_v24 = vadd.f32 %v4252_v28, %v1793_v0  ;;  %v3025_v59 = vpop.f32.mrb[141].mxu0 }
 0x6bc   :  { %v1796_v33 = vpop.f32.mrb[142].mxu0 }
 0x6bd   :  { %v1797_v7 = vadd.f32 %v4252_v28, %v1796_v33  ;;  %v3026_v49 = vpop.f32.mrb[143].mxu0  ;;  %v1848_v53 = vmax.f32 %v1794_v24, 0.0 }
 0x6bf   :  { %v1849_v56 = vmax.f32 %v1797_v7, 0.0 }
 0x6c1   :  { %v1862_v34 = vpack.c.bf16 %v1849_v56, %v1848_v53 }
 0x6c3   :  { %3056 = vmatmul.mubr.msk.bf16.vlgmr.msra.gmra.mrb[140].mxu1 %vm94_vm1, %v1862_v34 }
 0x6c4   :  { %v1801_v36 = vpop.f32.mrb[144].mxu0  ;;  %3059 = vmatprep.mubr.msk.bf16.mxu1 %vm3263_vm0, %v3262_v3 }
 0x6c5   :  { %v1802_v1 = vadd.f32 %v4252_v28, %v1801_v36  ;;  %v3029_v60 = vpop.f32.mrb[145].mxu0 }
 0x6c6   :  { %v1804_v17 = vpop.f32.mrb[146].mxu0 }
 0x6c7   :  { %v1805_v40 = vadd.f32 %v4252_v28, %v1804_v17  ;;  %v3030_v4 = vpop.f32.mrb[147].mxu0  ;;  %v1850_v54 = vmax.f32 %v1802_v1, 0.0 }
 0x6c9   :  { %v1851_v47 = vmax.f32 %v1805_v40, 0.0 }
 0x6cb   :  { %v1863_v50 = vpack.c.bf16 %v1851_v47, %v1850_v54 }
 0x6cc   :  { %v1809_v32 = vpop.f32.mrb[148].mxu0 }
 0x6cd   :  { %v1810_v18 = vadd.f32 %v4252_v28, %v1809_v32  ;;  %v3033_v11 = vpop.f32.mrb[149].mxu0  ;;  %3060 = vmatmul.mubr.msk.bf16.gmra.mrb[144].mxu1 %vm94_vm1, %v1863_v50 }
 0x6ce   :  { %v1812_v2 = vpop.f32.mrb[150].mxu0  ;;  %3063 = vmatprep.mubr.msk.bf16.mxu1 %vm3263_vm0, %v3262_v3 }
 0x6cf   :  { %v1813_v62 = vadd.f32 %v4252_v28, %v1812_v2  ;;  %v3034_v41 = vpop.f32.mrb[151].mxu0  ;;  %v1852_v58 = vmax.f32 %v1810_v18, 0.0 }
 0x6d1   :  { %v1853_v9 = vmax.f32 %v1813_v62, 0.0 }
 0x6d3   :  { %v1864_v30 = vpack.c.bf16 %v1853_v9, %v1852_v58 }
 0x6d4   :  { %v1817_v26 = vpop.f32.mrb[152].mxu0 }
 0x6d5   :  { %v1818_v44 = vadd.f32 %v4252_v28, %v1817_v26  ;;  %v3037_v38 = vpop.f32.mrb[153].mxu0  ;;  %3064 = vmatmul.mubr.msk.bf16.gmra.mrb[148].mxu1 %vm94_vm1, %v1864_v30 }
 0x6d6   :  { %v1820_v51 = vpop.f32.mrb[154].mxu0  ;;  %3067 = vmatprep.mubr.msk.bf16.mxu1 %vm3263_vm0, %v3262_v3 }
 0x6d7   :  { %v1821_v14 = vadd.f32 %v4252_v28, %v1820_v51  ;;  %v3038_v8 = vpop.f32.mrb[155].mxu0  ;;  %v1854_v21 = vmax.f32 %v1818_v44, 0.0 }
 0x6d9   :  { %v1855_v10 = vmax.f32 %v1821_v14, 0.0 }
 0x6db   :  { %v1865_v31 = vpack.c.bf16 %v1855_v10, %v1854_v21 }
 0x6dc   :  { %v1825_v13 = vpop.f32.mrb[156].mxu0 }
 0x6dd   :  { %v1826_v52 = vadd.f32 %v4252_v28, %v1825_v13  ;;  %v3041_v45 = vpop.f32.mrb[157].mxu0  ;;  %3068 = vmatmul.mubr.msk.bf16.gmra.mrb[152].mxu1 %vm94_vm1, %v1865_v31 }
 0x6de   :  { %v1828_v20 = vpop.f32.mrb[158].mxu0  ;;  %3071 = vmatprep.mubr.msk.bf16.mxu1 %vm3263_vm0, %v3262_v3 }
 0x6df   :  { %v1829_v0 = vadd.f32 %v4252_v28, %v1828_v20  ;;  %v3042_v24 = vpop.f32.mrb[159].mxu0  ;;  %v1856_v59 = vmax.f32 %v1826_v52, 0.0 }
 0x6e1   :  { %v1857_v33 = vmax.f32 %v1829_v0, 0.0 }
 0x6e3   :  { %v1866_v7 = vpack.c.bf16 %v1857_v33, %v1856_v59 }
 0x6e4   :  { %v1833_v49 = vpop.f32.mrb[160].mxu0 }
 0x6e5   :  { %v1834_v53 = vadd.f32 %v4252_v28, %v1833_v49  ;;  %v3045_v56 = vpop.f32.mrb[161].mxu0  ;;  %3072 = vmatmul.mubr.msk.bf16.gmra.mrb[156].mxu1 %vm94_vm1, %v1866_v7 }
 0x6e6   :  { %v1836_v34 = vpop.f32.mrb[162].mxu0  ;;  %3075 = vmatprep.mubr.msk.bf16.mxu1 %vm3263_vm0, %v3262_v3 }
 0x6e7   :  { %v1837_v36 = vadd.f32 %v4252_v28, %v1836_v34  ;;  %v3046_v1 = vpop.f32.mrb[163].mxu0  ;;  %v1858_v60 = vmax.f32 %v1834_v53, 0.0 }
 0x6e9   :  { %v1859_v17 = vmax.f32 %v1837_v36, 0.0 }
 0x6eb   :  { %v1867_v40 = vpack.c.bf16 %v1859_v17, %v1858_v60 }
 0x6ec   :  { %v1841_v4 = vpop.f32.mrb[164].mxu0 }
 0x6ed   :  { %v1842_v54 = vadd.f32 %v4252_v28, %v1841_v4  ;;  %v3049_v47 = vpop.f32.mrb[165].mxu0  ;;  %3076 = vmatmul.mubr.msk.bf16.gmra.mrb[160].mxu1 %vm94_vm1, %v1867_v40 }
 0x6ee   :  { %v1844_v50 = vpop.f32.mrb[166].mxu0  ;;  %3079 = vmatprep.mubr.msk.bf16.mxu1 %vm3263_vm0, %v3262_v3 }
 0x6ef   :  { %v1845_v32 = vadd.f32 %v4252_v28, %v1844_v50  ;;  %v3050_v18 = vpop.f32.mrb[167].mxu0  ;;  %v1860_v11 = vmax.f32 %v1842_v54, 0.0 }
 0x6f1   :  { %v1861_v2 = vmax.f32 %v1845_v32, 0.0 }
 0x6f3   :  { %v1868_v62 = vpack.c.bf16 %v1861_v2, %v1860_v11 }
 0x6f5   :  { %3080 = vmatmul.mubr.msk.bf16.gmra.mrb[164].mxu1 %vm94_vm1, %v1868_v62 }
 0x6f6   :  { %3105 = vmatprep.mubr.msk.bf16.mxu1 %vm3263_vm0, %v3262_v3 }
 0x796   :  { %v1940_v41 = vpop.f32.mrb[140].mxu1 }
 0x797   :  { %2009 = vrot.lane.b32.xlu1 %v1940_v41, %s3264_s4  ;;  %v3057_v58 = vpop.f32.mrb[141].mxu1 }
 0x798   :  { %v1943_v9 = vpop.f32.mrb[142].mxu1 }
 0x799   :  { %2011 = vrot.lane.b32.xlu0 %v1943_v9, %s3264_s4  ;;  %v3058_v30 = vpop.f32.mrb[143].mxu1 }
 0x79a   :  { %v3267_v30 = vmov 0  }
 0x79b   :  { %3136 = vset.pattern.permute.xlu1 %v3267_v30  ;;  %3137 = vset.pattern.permute.xlu0 %v3267_v30 }
 0x7a0   :  { %v1948_v26 = vpop.f32.mrb[144].mxu1 }
 0x7a1   :  { %2013 = vrot.lane.b32.xlu1 %v1948_v26, %s3264_s4  ;;  %v3061_v28 = vpop.f32.mrb[145].mxu1 }
 0x7a2   :  { %v1951_v44 = vpop.f32.mrb[146].mxu1 }
 0x7a3   :  { %v3062_v38 = vpop.f32.mrb[147].mxu1 }
 0x7a5   :  { %2015 = vrot.lane.b32.xlu1 %v1951_v44, %s3264_s4 }
 0x7a8   :  { %v1956_v51 = vpop.f32.mrb[148].mxu1 }
 0x7a9   :  { %2017 = vrot.lane.b32.xlu0 %v1956_v51, %s3264_s4  ;;  %v3065_v14 = vpop.f32.mrb[149].mxu1 }
 0x7aa   :  { %v1959_v8 = vpop.f32.mrb[150].mxu1 }
 0x7ab   :  { %2019 = vrot.lane.b32.xlu1 %v1959_v8, %s3264_s4  ;;  %v3066_v21 = vpop.f32.mrb[151].mxu1 }
 0x7b0   :  { %v1964_v10 = vpop.f32.mrb[152].mxu1 }
 0x7b1   :  { %2021 = vrot.lane.b32.xlu0 %v1964_v10, %s3264_s4  ;;  %v3069_v31 = vpop.f32.mrb[153].mxu1 }
 0x7b2   :  { %v1967_v13 = vpop.f32.mrb[154].mxu1 }
 0x7b3   :  { %2023 = vrot.lane.b32.xlu1 %v1967_v13, %s3264_s4  ;;  %v3070_v52 = vpop.f32.mrb[155].mxu1 }
 0x7b8   :  { %v1972_v45 = vpop.f32.mrb[156].mxu1 }
 0x7b9   :  { %2025 = vrot.lane.b32.xlu0 %v1972_v45, %s3264_s4  ;;  %v3073_v20 = vpop.f32.mrb[157].mxu1 }
 0x7ba   :  { %v1975_v0 = vpop.f32.mrb[158].mxu1 }
 0x7bb   :  { %2027 = vrot.lane.b32.xlu1 %v1975_v0, %s3264_s4  ;;  %v3074_v24 = vpop.f32.mrb[159].mxu1 }
 0x7c0   :  { %v1980_v59 = vpop.f32.mrb[160].mxu1 }
 0x7c1   :  { %2029 = vrot.lane.b32.xlu0 %v1980_v59, %s3264_s4  ;;  %v3077_v33 = vpop.f32.mrb[161].mxu1 }
 0x7c2   :  { %v1983_v7 = vpop.f32.mrb[162].mxu1 }
 0x7c3   :  { %2031 = vrot.lane.b32.xlu1 %v1983_v7, %s3264_s4  ;;  %v3078_v49 = vpop.f32.mrb[163].mxu1 }
 0x7c8   :  { %v1988_v53 = vpop.f32.mrb[164].mxu1 }
 0x7c9   :  { %2033 = vrot.lane.b32.xlu0 %v1988_v53, %s3264_s4  ;;  %v3081_v56 = vpop.f32.mrb[165].mxu1  ;;  %v3175_v53 = vld [vmem:[%s4492_s10] sm:$0xff]  }
 0x7ca   :  { %v1991_v34 = vpop.f32.mrb[166].mxu1  ;;  %v3176_v56 = vld [vmem:[%s4457_s21] sm:$0xff]  }
 0x7cb   :  { %2035 = vrot.lane.b32.xlu1 %v1991_v34, %s3264_s4  ;;  %v3082_v36 = vpop.f32.mrb[167].mxu1  ;;  %v3178_v34 = vld [vmem:[%s4456_s20] sm:$0xff]   ;;  %3102 = vmatpush3.bf16.msra.mxu1 %v3176_v56 }
 0x7cc   :  { %v3177_v36 = vld [vmem:[%s4457_s21 + $0x8] sm:$0xff]   ;;  %3103 = vmatprep.subr.bf16.mxu1 %v3262_v3 }
 0x7cf   :  { %2100 = vrot.lane.b32.xlu1 %v4195_v22, %s3266_s18  ;;  %3104 = vmatpush3.bf16.msra.mxu1 %v3177_v36 }
 0x7d0   :  { %3117 = vmatprep.subr.bf16.mxu1 %v3262_v3 }
 0x7d3   :  { %2102 = vrot.lane.b32.xlu1 %v4203_v16, %s3266_s18 }
 0x7d7   :  { %2104 = vrot.lane.b32.xlu1 %v4211_v46, %s3266_s18 }
 0x7db   :  { %2106 = vrot.lane.b32.xlu1 %v4219_v27, %s3266_s18 }
 0x7df   :  { %2108 = vrot.lane.b32.xlu1 %v4227_v23, %s3266_s18 }
 0x7e3   :  { %2110 = vrot.lane.b32.xlu1 %v4235_v39, %s3266_s18 }
 0x7e7   :  { %2112 = vrot.lane.b32.xlu1 %v4243_v63, %s3266_s18 }
 0x809   :  { %v2010_v1 = vpop.permute.xlu1 %2009 }
 0x80a   :  { %v2051_v17 = vmul.f32 %v2010_v1, %v3531_v29  ;;  %v3179_v1 = vld [vmem:[%s4456_s20 + $0x8] sm:$0xff]   ;;  %s3268_s20 = smov 116  }
 0x80b   :  { %v2012_v60 = vpop.permute.xlu0 %2011 }
 0x80c   :  { %v2052_v40 = vmul.f32 %v2012_v60, %v3541_v35 }
 0x80e   :  { %v2065_v4 = vpack.c.bf16 %v2052_v40, %v2051_v17 }
 0x810   :  { %2079 = vrot.lane.b32.xlu0 %v2065_v4, %s3265_s3 }
 0x813   :  { %v2014_v22 = vpop.permute.xlu1 %2013 }
 0x814   :  { %v2053_v46 = vmul.f32 %v2014_v22, %v3554_v42 }
 0x817   :  { %v2016_v16 = vpop.permute.xlu1 %2015 }
 0x818   :  { %v2054_v27 = vmul.f32 %v2016_v16, %v3564_v48 }
 0x81a   :  { %v2066_v23 = vpack.c.bf16 %v2054_v27, %v2053_v46  ;;  %v3210_v46 = vld [vmem:[%s4482_s7] sm:$0xff] }
 0x81b   :  { %v2018_v54 = vpop.permute.xlu0 %2017 }
 0x81c   :  { %2081 = vrot.lane.b32.xlu0 %v2066_v23, %s3265_s3  ;;  %v2055_v63 = vmul.f32 %v2018_v54, %v3577_v55 }
 0x81d   :  { %v2020_v39 = vpop.permute.xlu1 %2019 }
 0x81e   :  { %v2056_v29 = vmul.f32 %v2020_v39, %v3587_v61 }
 0x820   :  { %v2067_v47 = vpack.c.bf16 %v2056_v29, %v2055_v63  ;;  %v3211_v29 = vld [vmem:[%s4482_s7 + $0x8] sm:$0xff] }
 0x822   :  { %2083 = vrot.lane.b32.xlu0 %v2067_v47, %s3265_s3 }
 0x823   :  { %v2022_v35 = vpop.permute.xlu0 %2021 }
 0x824   :  { %v2057_v32 = vmul.f32 %v2022_v35, %v3600_v5 }
 0x825   :  { %v2024_v50 = vpop.permute.xlu1 %2023 }
 0x826   :  { %v2058_v42 = vmul.f32 %v2024_v50, %v3610_v12  ;;  %v2194_v12 = vld [vmem:[%s4491_s13] sm:$0xff] }
 0x827   :  { %2198 = vperm.xlu1 %3136, %v2194_v12  }
 0x828   :  { %v2068_v18 = vpack.c.bf16 %v2058_v42, %v2057_v32 }
 0x82a   :  { %2085 = vrot.lane.b32.xlu0 %v2068_v18, %s3265_s3  ;;  %v3180_v18 = vld [vmem:[%s4459_s23] sm:$0xff]  }
 0x82b   :  { %v2026_v48 = vpop.permute.xlu0 %2025 }
 0x82c   :  { %v2059_v2 = vmul.f32 %v2026_v48, %v3623_v19  ;;  %v3181_v48 = vld [vmem:[%s4459_s23 + $0x8] sm:$0xff]  }
 0x82d   :  { %v2028_v11 = vpop.permute.xlu1 %2027 }
 0x82e   :  { %v2060_v55 = vmul.f32 %v2028_v11, %v3633_v25 }
 0x830   :  { %v2069_v62 = vpack.c.bf16 %v2060_v55, %v2059_v2  ;;  %v2584_v2 = vld [vmem:[%s4458_s22] ss:$0 sm:$0xff] }
 0x832   :  { %2087 = vrot.lane.b32.xlu0 %v2069_v62, %s3265_s3 }
 0x833   :  { %v2030_v61 = vpop.permute.xlu0 %2029 }
 0x834   :  { %v2061_v58 = vmul.f32 %v2030_v61, %v3646_v43 }
 0x835   :  { %v2032_v41 = vpop.permute.xlu1 %2031 }
 0x836   :  { %v2062_v5 = vmul.f32 %v2032_v41, %v3656_v57 }
 0x838   :  { %v2070_v9 = vpack.c.bf16 %v2062_v5, %v2061_v58 }
 0x83a   :  { %2089 = vrot.lane.b32.xlu0 %v2070_v9, %s3265_s3 }
 0x83b   :  { %v2034_v19 = vpop.permute.xlu0 %2033 }
 0x83c   :  { %v2063_v26 = vmul.f32 %v2034_v19, %v3669_v15 }
 0x83d   :  { %v2036_v25 = vpop.permute.xlu1 %2035 }
 0x83e   :  { %v2064_v28 = vmul.f32 %v2036_v25, %v3679_v37 }
 0x840   :  { %v2071_v43 = vpack.c.bf16 %v2064_v28, %v2063_v26 }
 0x841   :  { %v2101_v57 = vpop.permute.xlu1 %2100 }
 0x842   :  { %2091 = vrot.lane.b32.xlu0 %v2071_v43, %s3265_s3 }
 0x845   :  { %v2103_v51 = vpop.permute.xlu1 %2102 }
 0x849   :  { %v2105_v15 = vpop.permute.xlu1 %2104 }
 0x84d   :  { %v2107_v10 = vpop.permute.xlu1 %2106 }
 0x851   :  { %v2109_v52 = vpop.permute.xlu1 %2108 }
 0x855   :  { %v2111_v0 = vpop.permute.xlu1 %2110 }
 0x859   :  { %v2113_v33 = vpop.permute.xlu1 %2112 }
 0x882   :  { %v2080_v44 = vpop.permute.xlu0 %2079 }
 0x883   :  { %v2116_v38 = vsel %vm467_vm4, %v2080_v44, %v2101_v57 }
 0x884   :  { %3084 = vmatpush3.bf16.msra.mxu0 %v2116_v38 }
 0x885   :  { %3085 = vmatprep.subr.bf16.mxu0 %v3262_v3 }
 0x88e   :  { %v2082_v14 = vpop.permute.xlu0 %2081 }
 0x88f   :  { %v2120_v8 = vsel %vm467_vm4, %v2082_v14, %v2103_v51 }
 0x890   :  { %3086 = vmatpush3.bf16.msra.mxu0 %v2120_v8 }
 0x891   :  { %3087 = vmatprep.subr.bf16.mxu0 %v3262_v3 }
 0x894   :  { %v2084_v21 = vpop.permute.xlu0 %2083 }
 0x895   :  { %v2124_v37 = vsel %vm467_vm4, %v2084_v21, %v2105_v15 }
 0x896   :  { %3088 = vmatpush3.bf16.msra.mxu0 %v2124_v37 }
 0x897   :  { %3089 = vmatprep.subr.bf16.mxu0 %v3262_v3 }
 0x89c   :  { %v2086_v31 = vpop.permute.xlu0 %2085 }
 0x89d   :  { %v2128_v13 = vsel %vm467_vm4, %v2086_v31, %v2107_v10 }
 0x89e   :  { %3090 = vmatpush3.bf16.msra.mxu0 %v2128_v13 }
 0x89f   :  { %3091 = vmatprep.subr.bf16.mxu0 %v3262_v3 }
 0x8a4   :  { %v2088_v45 = vpop.permute.xlu0 %2087 }
 0x8a5   :  { %v2132_v20 = vsel %vm467_vm4, %v2088_v45, %v2109_v52 }
 0x8a6   :  { %3092 = vmatpush3.bf16.msra.mxu0 %v2132_v20  ;;  %v2199_v60 = vpop.permute.xlu1 %2198 }
 0x8a7   :  { %3093 = vmatprep.subr.bf16.mxu0 %v3262_v3 }
 0x8ac   :  { %v2090_v24 = vpop.permute.xlu0 %2089 }
 0x8ad   :  { %v2136_v59 = vsel %vm467_vm4, %v2090_v24, %v2111_v0 }
 0x8ae   :  { %3094 = vmatpush3.bf16.msra.mxu0 %v2136_v59 }
 0x8af   :  { %3095 = vmatprep.subr.bf16.mxu0 %v3262_v3 }
 0x8b4   :  { %v2092_v7 = vpop.permute.xlu0 %2091 }
 0x8b5   :  { %v2140_v49 = vsel %vm467_vm4, %v2092_v7, %v2113_v33 }
 0x8b6   :  { %3096 = vmatpush3.bf16.msra.mxu0 %v2140_v49 }
 0x8b7   :  { %3109 = vmatprep.subr.bf16.mxu0 %v3262_v3 }
 0x8b9   :  { %3098 = vmatmul.mubr.msk.bf16.vlgmr.msra.gmra.mrb[168].mxu0 %vm2149_vm8, %v3175_v53 }
 0x8ba   :  { %3113 = vmatprep.mubr.msk.bf16.mxu0 %vm3263_vm0, %v3262_v3  ;;  %3110 = vmatpush3.bf16.msra.mxu0 %v3178_v34 }
 0x8bb   :  { %3111 = vmatprep.subr.bf16.mxu0 %v3262_v3 }
 0x8be   :  { %3112 = vmatpush3.bf16.msra.mxu0 %v3179_v1 }
 0x8c1   :  { %3114 = vmatmul.mubr.msk.bf16.vlgmr.msra.gmra.mrb[172].mxu0 %vm94_vm1, %v3427_v6  ;;  %v2195_v6 = vld [vmem:[%s4491_s13 + $0x8] sm:$0xff]  ;;  %s3269_s13 = smov [#allocation4]  }
 0x8c2   :  { %s2437_s23 = sshll.u32 %s3269_s13, 4  ;;  %s2438_s23 = int_to_ptr.vmem [resolvable:$true] %s2437_s23 }
 0x8c3   :  { %s3214_s3 = scalar_lea.vmem %s2438_s23, 256  ;;  %p3219_p1 = scmp.lt.s32.totalorder %s2438_s23, %s2438_s23 }
 0x8c4   :  { %p3215_p0 = scmp.ne.s32.totalorder %s2438_s23, %s3214_s3  ;;  %p3220_p2 = scmp.lt.s32.totalorder %s3214_s3, %s3214_s3 }
 0x8c6   :  { %p3221_p3 = por %p3220_p2, %p3219_p1 }
 0x8c8   :  { %p3222_p4 = pnand %p3221_p3, %p3215_p0 }
 0x98c   :  { %v2187_v17 = vpop.f32.mrb[168].mxu0 }
 0x98d   :  { %v3099_v40 = vpop.f32.mrb[169].mxu0  ;;  %v2206_v4 = vmul.f32 %v2199_v60, %v2187_v17 }
 0x98e   :  { %v2190_v22 = vpop.f32.mrb[170].mxu0 }
 0x98f   :  { %v2216_v16 = vpack.c.bf16 %v2190_v22, %v2187_v17  ;;  %v2208_v27 = vadd.f32 %v3210_v46, %v2206_v4  ;;  %v3100_v23 = vpop.f32.mrb[171].mxu0 }
 0x991   :  { %2222 = vrot.lane.b32.xlu0 %v2216_v16, %s3268_s20  ;;  %2210 = vst.msk [vmem:[#allocation4] sm:$0xff] %vm467_vm4, %v2208_v27 }
 0x994   :  { %v2328_v35 = vpop.f32.mrb[172].mxu0 }
 0x995   :  { %2203 = vperm.xlu0 %3137, %v2195_v6   ;;  %v3115_v50 = vpop.f32.mrb[173].mxu0 }
 0x996   :  { %v2331_v32 = vpop.f32.mrb[174].mxu0 }
 0x997   :  { %v3116_v42 = vpop.f32.mrb[175].mxu0 }
 0xa03   :  { %v2223_v54 = vpop.permute.xlu0 %2222 }
 0xa04   :  { %3106 = vmatmul.mubr.msk.bf16.vlgmr.msra.gmra.mrb[168].mxu1 %vm94_vm1, %v2223_v54 }
 0xa05   :  { %3121 = vmatprep.mubr.msk.bf16.mxu1 %vm3263_vm0, %v3262_v3  ;;  %3118 = vmatpush3.bf16.msra.mxu1 %v3180_v18 }
 0xa06   :  { %3119 = vmatprep.subr.bf16.mxu1 %v3262_v3 }
 0xa09   :  { %3120 = vmatpush3.bf16.msra.mxu1 %v3181_v48 }
 0xa14   :  { %v2204_v39 = vpop.permute.xlu0 %2203 }
 0xa15   :  { %v2207_v63 = vmul.f32 %v2204_v39, %v2190_v22 }
 0xa17   :  { %v2209_v47 = vadd.f32 %v3211_v29, %v2207_v63 }
 0xa19   :  { %2211 = vst.msk [vmem:[#allocation4 + $0x8] sm:$0xff] %vm467_vm4, %v2209_v47 }
 0xad7   :  { %v2273_v11 = vpop.f32.mrb[168].mxu1 }
 0xad8   :  { %v2329_v55 = vadd.f32 %v2328_v35, %v2273_v11  ;;  %v3107_v62 = vpop.f32.mrb[169].mxu1 }
 0xad9   :  { %v2276_v61 = vpop.f32.mrb[170].mxu1 }
 0xada   :  { %v2342_v41 = vadd.f32 %v2584_v2, %v2329_v55  ;;  %v2332_v58 = vadd.f32 %v2331_v32, %v2276_v61  ;;  %v3108_v5 = vpop.f32.mrb[171].mxu1 }
 0xadc   :  { %v2343_v9 = vadd.f32 %v2584_v2, %v2332_v58  ;;  %v2344_v12 = vmax.f32 %v2342_v41, 0.0 }
 0xade   :  { %v2345_v30 = vmax.f32 %v2343_v9, 0.0 }
 0xae0   :  { %v2346_v3 = vpack.c.bf16 %v2345_v30, %v2344_v12 }
 0xae2   :  { %3122 = vmatmul.mubr.msk.bf16.vlgmr.msra.gmra.mrb[172].mxu1 %vm94_vm1, %v2346_v3 }
 0xae3   :  { %3225 = shalt.err (!%p3222_p4)
}
 0xae4   :  { %s3226_s10 = scalar_lea.hbm %s4462_s26, 256 }
 0xae5   :  { %p3227_p5 = scmp.ne.s32.totalorder %s4462_s26, %s3226_s10  ;;  %p3230_p6 = scmp.lt.u32.totalorder %s3226_s10, %s4462_s26 }
 0xae7   :  { %p3232_p7 = pnand %p3230_p6, %p3227_p5 }
 0xae9   :  { %3235 = shalt.err (!%p3232_p7)
}
 0xaea   :  { %s3270_s28 = smov 128   ;;  %s3271_s8 = smov 8   ;;  %v2588_v25 = vld [vmem:[%s4460_s24] ss:$0 sm:$0xff]  ;;  %v3213_v38 = vld [vmem:[%s4483_s9 + $0x8] sm:$0xff] }
 0xaeb   :  { %2443 = dma.vmem_to_hbm [thread:$0]  %s2438_s23, 256, %s4462_s26, [#allocation5], %s3270_s28, %s3270_s28, %s3271_s8  }
 0xaec   :  { %v3212_v26 = vld [vmem:[%s4483_s9] sm:$0xff]  ;;  %s3272_s30 = smov [#allocation2]  }
 0xaed   :  { %s2425_s2 = sshll.u32 %s3272_s30, 4  ;;  %s2426_s2 = int_to_ptr.vmem [resolvable:$true] %s2425_s2 }
 0xaee   :  { %s3236_s24 = scalar_lea.vmem %s2426_s2, 256  ;;  %p3241_p9 = scmp.lt.s32.totalorder %s2426_s2, %s2426_s2 }
 0xaef   :  { %p3237_p8 = scmp.ne.s32.totalorder %s2426_s2, %s3236_s24  ;;  %p3242_p10 = scmp.lt.s32.totalorder %s3236_s24, %s3236_s24 }
 0xaf1   :  { %p3243_p11 = por %p3242_p10, %p3241_p9 }
 0xaf3   :  { %p3244_p12 = pnand %p3243_p11, %p3237_p8 }
 0xbb5   :  { %v2400_v19 = vpop.f32.mrb[172].mxu1 }
 0xbb6   :  { %v2407_v28 = vadd.f32 %v3212_v26, %v2400_v19  ;;  %v3123_v43 = vpop.f32.mrb[173].mxu1 }
 0xbb7   :  { %v2403_v57 = vpop.f32.mrb[174].mxu1 }
 0xbb8   :  { %v2416_v44 = vadd.f32 %v2588_v25, %v2407_v28  ;;  %v2408_v51 = vadd.f32 %v3213_v38, %v2403_v57  ;;  %v3124_v14 = vpop.f32.mrb[175].mxu1 }
 0xbba   :  { %2418 = vst.msk [vmem:[#allocation2] sm:$0xff] %vm94_vm1, %v2416_v44  ;;  %v2417_v8 = vadd.f32 %v2588_v25, %v2408_v51 }
 0xbbc   :  { %2419 = vst.msk [vmem:[#allocation2 + $0x8] sm:$0xff] %vm94_vm1, %v2417_v8 }
 0xbbd   :  { %3247 = shalt.err (!%p3244_p12)
}
 0xbbe   :  { %s3248_s18 = scalar_lea.hbm %s4461_s25, 256 }
 0xbbf   :  { %p3249_p13 = scmp.ne.s32.totalorder %s4461_s25, %s3248_s18  ;;  %p3252_p0 = scmp.lt.u32.totalorder %s3248_s18, %s4461_s25 }
 0xbc1   :  { %p3254_p1 = pnand %p3252_p0, %p3249_p13 }
 0xbc3   :  { %3257 = shalt.err (!%p3254_p1)
}
 0xbc4   :  { %2431 = dma.vmem_to_hbm [thread:$0]  %s2426_s2, 256, %s4461_s25, [#allocation3], %s3270_s28, %s3270_s28, %s3271_s8  }
 0xbc5   :  { %3258 = dma.done.wait [#allocation3], 256  }
 0xbc6   :  { %3259 = vsyncadd [#allocation3], 4294967040 }
 0xbc7   :  { %3260 = dma.done.wait [#allocation5], 256  }
 0xbc8   :  { %3261 = vsyncadd [#allocation5], 4294967040 }
 0xbc9   :  { %2450 = vsyncpa [#allocation3], 1 }
 0xbca   :  { %2451 = vsyncpa [#allocation5], 1 }

</bundles_post_ra>
